<compile_context>
chip_gen: v7x
topology: tpu7x:2x2x1
jax: 0.10.0
libtpu: 0.0.40
codegen_flags: <defaults>
</compile_context>

<pallas_src>
import functools

import jax
import jax.numpy as jnp
from jax.experimental import pallas as pl
from jax.experimental.pallas import tpu as pltpu

LANE = 128                 # TPU lane width; all feature dims are padded to it.
MXU_DTYPE = jnp.bfloat16   # MXU operand dtype (f32 accumulation everywhere).


def _round_up(v, m):
    return (v + m - 1) // m * m


def _resident_spec(shape):
    # Weight/bias block that stays resident (same block every grid step).
    return pl.BlockSpec(shape, lambda *_: (0,) * len(shape))


def _row_tile_spec(tile, width):
    # Row-tiled block over the first (node/edge) axis.
    return pl.BlockSpec((tile, width), lambda i, *_: (i, 0))


# ----------------------------------------------------------------------------
# Kernels
# ----------------------------------------------------------------------------
def _encode_kernel(x_ref, t_ref, w1_ref, b1_ref, w2_ref, b2_ref,
                   tw_ref, tb_ref, o_ref):
    # h = relu(x @ W1 + b1); y = h @ W2 + b2 + relu(t * tw + tb)
    h = jnp.dot(x_ref[...], w1_ref[...], preferred_element_type=jnp.float32)
    h = jnp.maximum(h + b1_ref[...], 0.0)
    y = jnp.dot(h.astype(w2_ref.dtype), w2_ref[...],
                preferred_element_type=jnp.float32) + b2_ref[...]
    # timestep embedding: per-node scalar t -> VPU outer product (no K=1 GEMM)
    temb = jnp.maximum(t_ref[...] * tw_ref[...] + tb_ref[...], 0.0)
    o_ref[...] = (y + temb).astype(o_ref.dtype)


def _edge_kernel(dst_ref, xs_ref, xd_ref, w1s_ref, w1d_ref, b1_ref,
                 w2_ref, b2_ref, agg_ref, eff_ref, *, n_edges, tile_e):
    t = pl.program_id(0)

    @pl.when(t == 0)
    def _():
        agg_ref[...] = jnp.zeros_like(agg_ref)

    # relational model: relu(x_src @ W1s + x_dst @ W1d + (b1 + W1_rel_row))
    h = jnp.dot(xs_ref[...], w1s_ref[...], preferred_element_type=jnp.float32)
    h += jnp.dot(xd_ref[...], w1d_ref[...], preferred_element_type=jnp.float32)
    h = jnp.maximum(h + b1_ref[...], 0.0)
    eff = jnp.dot(h.astype(w2_ref.dtype), w2_ref[...],
                  preferred_element_type=jnp.float32) + b2_ref[...]
    eff = jnp.maximum(eff, 0.0)

    # zero out padded edges so they contribute nothing to the scatter-add
    base = t * tile_e
    row = jax.lax.broadcasted_iota(jnp.int32, eff.shape, 0) + base
    eff_ref[...] = jnp.where(row < n_edges, eff, 0.0)

    # scatter-add effects into the VMEM-resident per-node accumulator
    # TODO(synk): for very large N the (N, 128) accumulator must be tiled
    # (e.g. pre-sorted-by-dst segment sum); here it is kept fully resident.
    def body(e, carry):
        d = dst_ref[base + e]
        agg_ref[pl.ds(d, 1), :] = (agg_ref[pl.ds(d, 1), :]
                                   + eff_ref[pl.ds(e, 1), :])
        return carry

    jax.lax.fori_loop(0, tile_e, body, 0)


def _obj_kernel(x_ref, agg_ref, w1x_ref, w1a_ref, b1_ref, w2_ref, b2_ref,
                o_ref, *, final_relu):
    # object model: relu(x @ W1x + agg @ W1a + b1) @ W2 + b2  (+ relu)
    h = jnp.dot(x_ref[...], w1x_ref[...], preferred_element_type=jnp.float32)
    h += jnp.dot(agg_ref[...].astype(w1a_ref.dtype), w1a_ref[...],
                 preferred_element_type=jnp.float32)
    h = jnp.maximum(h + b1_ref[...], 0.0)
    y = jnp.dot(h.astype(w2_ref.dtype), w2_ref[...],
                preferred_element_type=jnp.float32) + b2_ref[...]
    if final_relu:
        y = jnp.maximum(y, 0.0)
    o_ref[...] = y.astype(o_ref.dtype)


def _obj_decode_kernel(x_ref, agg_ref, w1x_ref, w1a_ref, b1_ref, w2_ref, b2_ref,
                       d1w_ref, d1b_ref, d2w_ref, d2b_ref, o_ref):
    # conv3 object model (no output relu) fused with decode1 (relu) + decode2.
    h = jnp.dot(x_ref[...], w1x_ref[...], preferred_element_type=jnp.float32)
    h += jnp.dot(agg_ref[...].astype(w1a_ref.dtype), w1a_ref[...],
                 preferred_element_type=jnp.float32)
    h = jnp.maximum(h + b1_ref[...], 0.0)
    y = jnp.dot(h.astype(w2_ref.dtype), w2_ref[...],
                preferred_element_type=jnp.float32) + b2_ref[...]
    g = jnp.dot(y.astype(d1w_ref.dtype), d1w_ref[...],
                preferred_element_type=jnp.float32)
    g = jnp.maximum(g + d1b_ref[...], 0.0)
    out = jnp.dot(g.astype(d2w_ref.dtype), d2w_ref[...],
                  preferred_element_type=jnp.float32) + d2b_ref[...]
    o_ref[...] = out


# ----------------------------------------------------------------------------
# Layer wrappers
# ----------------------------------------------------------------------------
def _encode(xp, t_node, kp, tile_n):
    n_pad = xp.shape[0]
    return pl.pallas_call(
        _encode_kernel,
        out_shape=jax.ShapeDtypeStruct((n_pad, LANE), MXU_DTYPE),
        grid=(n_pad // tile_n,),
        in_specs=[
            _row_tile_spec(tile_n, LANE),
            _row_tile_spec(tile_n, 1),
            _resident_spec((LANE, LANE)), _resident_spec((1, LANE)),
            _resident_spec((LANE, LANE)), _resident_spec((1, LANE)),
            _resident_spec((1, LANE)), _resident_spec((1, LANE)),
        ],
        out_specs=_row_tile_spec(tile_n, LANE),
        compiler_params=pltpu.CompilerParams(dimension_semantics=("parallel",)),
    )(xp, t_node, kp["enc1_w"], kp["enc1_b"], kp["enc2_w"], kp["enc2_b"],
      kp["t_w"], kp["t_b"])


def _edge_aggregate(h, src, dst, p, tile_e, n_edges):
    n_pad = h.shape[0]
    e_pad = src.shape[0]

    # index-driven gathers (O(E*H) bytes) instead of one-hot GEMMs
    x_src = jnp.take(h, src, axis=0)   # (E_pad, LANE)
    x_dst = jnp.take(h, dst, axis=0)   # (E_pad, LANE)

    return pl.pallas_call(
        functools.partial(_edge_kernel, n_edges=n_edges, tile_e=tile_e),
        out_shape=jax.ShapeDtypeStruct((n_pad, LANE), jnp.float32),
        grid_spec=pltpu.PrefetchScalarGridSpec(
            num_scalar_prefetch=1,
            grid=(e_pad // tile_e,),
            in_specs=[
                _row_tile_spec(tile_e, LANE),
                _row_tile_spec(tile_e, LANE),
                _resident_spec((LANE, LANE)), _resident_spec((LANE, LANE)),
                _resident_spec((1, LANE)),
                _resident_spec((LANE, LANE)), _resident_spec((1, LANE)),
            ],
            out_specs=pl.BlockSpec((n_pad, LANE), lambda i, *_: (0, 0)),
            scratch_shapes=[pltpu.VMEM((tile_e, LANE), jnp.float32)],
        ),
        compiler_params=pltpu.CompilerParams(dimension_semantics=("arbitrary",)),
    )(dst, x_src, x_dst, p["rel_w1_src"], p["rel_w1_dst"], p["rel_b1"],
      p["rel_w2"], p["rel_b2"])


def _object_update(h, agg, p, tile_n, *, final_relu):
    n_pad = h.shape[0]
    return pl.pallas_call(
        functools.partial(_obj_kernel, final_relu=final_relu),
        out_shape=jax.ShapeDtypeStruct((n_pad, LANE), MXU_DTYPE),
        grid=(n_pad // tile_n,),
        in_specs=[
            _row_tile_spec(tile_n, LANE),
            _row_tile_spec(tile_n, LANE),
            _resident_spec((LANE, LANE)), _resident_spec((LANE, LANE)),
            _resident_spec((1, LANE)),
            _resident_spec((LANE, LANE)), _resident_spec((1, LANE)),
        ],
        out_specs=_row_tile_spec(tile_n, LANE),
        compiler_params=pltpu.CompilerParams(dimension_semantics=("parallel",)),
    )(h, agg, p["obj_w1_x"], p["obj_w1_agg"], p["obj_b1"],
      p["obj_w2"], p["obj_b2"])


def _object_update_decode(h, agg, p, kp, tile_n):
    n_pad = h.shape[0]
    return pl.pallas_call(
        _obj_decode_kernel,
        out_shape=jax.ShapeDtypeStruct((n_pad, LANE), jnp.float32),
        grid=(n_pad // tile_n,),
        in_specs=[
            _row_tile_spec(tile_n, LANE),
            _row_tile_spec(tile_n, LANE),
            _resident_spec((LANE, LANE)), _resident_spec((LANE, LANE)),
            _resident_spec((1, LANE)),
            _resident_spec((LANE, LANE)), _resident_spec((1, LANE)),
            _resident_spec((LANE, LANE)), _resident_spec((1, LANE)),
            _resident_spec((LANE, LANE)), _resident_spec((1, LANE)),
        ],
        out_specs=_row_tile_spec(tile_n, LANE),
        compiler_params=pltpu.CompilerParams(dimension_semantics=("parallel",)),
    )(h, agg, p["obj_w1_x"], p["obj_w1_agg"], p["obj_b1"],
      p["obj_w2"], p["obj_b2"],
      kp["dec1_w"], kp["dec1_b"], kp["dec2_w"], kp["dec2_b"])


# ----------------------------------------------------------------------------
# Full forward pass
# ----------------------------------------------------------------------------
def gnn_denoiser_forward(kparams, x, edge_index, timestep, batch_index, *,
                         out_channels):
    n_nodes, in_ch = x.shape
    n_edges = edge_index.shape[1]

    tile_n = min(256, _round_up(n_nodes, 8))
    n_pad = _round_up(n_nodes, tile_n)
    tile_e = min(512, _round_up(n_edges, 8))
    e_pad = _round_up(n_edges, tile_e)

    # pad node features / per-node timestep / edge lists
    xp = jnp.zeros((n_pad, LANE), MXU_DTYPE).at[:n_nodes, :in_ch].set(
        x.astype(MXU_DTYPE))
    t_per_node = jnp.take(timestep.astype(jnp.float32), batch_index, axis=0)
    t_node = jnp.zeros((n_pad, 1), jnp.float32).at[:n_nodes, 0].set(t_per_node)
    src = jnp.zeros((e_pad,), jnp.int32).at[:n_edges].set(
        edge_index[0].astype(jnp.int32))
    dst = jnp.zeros((e_pad,), jnp.int32).at[:n_edges].set(
        edge_index[1].astype(jnp.int32))

    # encoder + timestep embedding
    h = _encode(xp, t_node, kparams, tile_n)

    # conv1, conv2 with fused output ReLU
    for name in ("conv1", "conv2"):
        agg = _edge_aggregate(h, src, dst, kparams[name], tile_e, n_edges)
        h = _object_update(h, agg, kparams[name], tile_n, final_relu=True)

    # conv3 (no ReLU) fused with decode1(+ReLU) and decode2
    agg = _edge_aggregate(h, src, dst, kparams["conv3"], tile_e, n_edges)
    out = _object_update_decode(h, agg, kparams["conv3"], kparams, tile_n)
    return out[:n_nodes, :out_channels]


# ----------------------------------------------------------------------------
# Parameters: logical (f32, PyTorch-like) -> kernel (padded/split/bf16)
# ----------------------------------------------------------------------------
def _dense_init(key, fan_in, fan_out):
    kw, kb = jax.random.split(key)
    scale = 1.0 / jnp.sqrt(jnp.float32(fan_in))
    w = jax.random.normal(kw, (fan_in, fan_out), jnp.float32) * scale
    b = jax.random.normal(kb, (fan_out,), jnp.float32) * 0.01
    return w, b


def _in_params(key, dim_obj, dim_rel, dim_eff, dim_hidden_obj, dim_hidden_rel):
    k1, k2, k3, k4 = jax.random.split(key, 4)
    rel_w1, rel_b1 = _dense_init(k1, 2 * dim_obj + dim_rel, dim_hidden_rel)
    rel_w2, rel_b2 = _dense_init(k2, dim_hidden_rel, dim_eff)
    obj_w1, obj_b1 = _dense_init(k3, dim_obj + dim_eff, dim_hidden_obj)
    obj_w2, obj_b2 = _dense_init(k4, dim_hidden_obj, dim_obj)
    return dict(rel_w1=rel_w1, rel_b1=rel_b1, rel_w2=rel_w2, rel_b2=rel_b2,
                obj_w1=obj_w1, obj_b1=obj_b1, obj_w2=obj_w2, obj_b2=obj_b2)


def make_params(key, in_channels, hidden_channels, out_channels):
    keys = jax.random.split(key, 8)
    p = {}
    p["t_w"], p["t_b"] = _dense_init(keys[0], 1, hidden_channels)
    p["enc1_w"], p["enc1_b"] = _dense_init(keys[1], in_channels, hidden_channels)
    p["enc2_w"], p["enc2_b"] = _dense_init(keys[2], hidden_channels, hidden_channels)
    p["dec1_w"], p["dec1_b"] = _dense_init(keys[3], hidden_channels, hidden_channels)
    p["dec2_w"], p["dec2_b"] = _dense_init(keys[4], hidden_channels, out_channels)
    for i, name in enumerate(["conv1", "conv2", "conv3"]):
        p[name] = _in_params(keys[5 + i], dim_obj=hidden_channels, dim_rel=1,
                             dim_eff=128, dim_hidden_obj=128, dim_hidden_rel=128)
    return p


def _pad2(w, rows, cols):
    out = jnp.zeros((rows, cols), jnp.float32)
    return out.at[:w.shape[0], :w.shape[1]].set(w)


def _pad_bias(b, cols):
    out = jnp.zeros((1, cols), jnp.float32)
    return out.at[0, :b.shape[0]].set(b)


def prepare_params(p, hidden_channels):
    """Pad feature dims to LANE, split concat weights, fold the all-ones
    relation column into the rel bias, cast MXU operands to bf16."""
    H = hidden_channels
    kp = {
        "enc1_w": _pad2(p["enc1_w"], LANE, LANE).astype(MXU_DTYPE),
        "enc1_b": _pad_bias(p["enc1_b"], LANE),
        "enc2_w": _pad2(p["enc2_w"], LANE, LANE).astype(MXU_DTYPE),
        "enc2_b": _pad_bias(p["enc2_b"], LANE),
        "t_w": _pad2(p["t_w"], 1, LANE),          # stays f32 (VPU outer product)
        "t_b": _pad_bias(p["t_b"], LANE),
        "dec1_w": _pad2(p["dec1_w"], LANE, LANE).astype(MXU_DTYPE),
        "dec1_b": _pad_bias(p["dec1_b"], LANE),
        "dec2_w": _pad2(p["dec2_w"], LANE, LANE).astype(MXU_DTYPE),
        "dec2_b": _pad_bias(p["dec2_b"], LANE),
    }
    for name in ("conv1", "conv2", "conv3"):
        c = p[name]
        kp[name] = {
            "rel_w1_src": _pad2(c["rel_w1"][:H], LANE, LANE).astype(MXU_DTYPE),
            "rel_w1_dst": _pad2(c["rel_w1"][H:2 * H], LANE, LANE).astype(MXU_DTYPE),
            # edge attr is all-ones (dim_rel=1): fold its weight row into bias
            "rel_b1": _pad_bias(c["rel_b1"] + c["rel_w1"][2 * H], LANE),
            "rel_w2": _pad2(c["rel_w2"], LANE, LANE).astype(MXU_DTYPE),
            "rel_b2": _pad_bias(c["rel_b2"], LANE),
            "obj_w1_x": _pad2(c["obj_w1"][:H], LANE, LANE).astype(MXU_DTYPE),
            "obj_w1_agg": _pad2(c["obj_w1"][H:], LANE, LANE).astype(MXU_DTYPE),
            "obj_b1": _pad_bias(c["obj_b1"], LANE),
            "obj_w2": _pad2(c["obj_w2"], LANE, LANE).astype(MXU_DTYPE),
            "obj_b2": _pad_bias(c["obj_b2"], LANE),
        }
    return kp


# ----------------------------------------------------------------------------
# Demo
# ----------------------------------------------------------------------------
if __name__ == "__main__":
    IN_CH, HIDDEN, OUT_CH = 4, 32, 4
    N_NODES, N_EDGES, N_GRAPHS = 16, 32, 2

    key = jax.random.PRNGKey(0)
    k_par, k_x, k_src, k_dst, k_t = jax.random.split(key, 5)

    params = make_params(k_par, IN_CH, HIDDEN, OUT_CH)
    kparams = prepare_params(params, HIDDEN)

    x = jax.random.normal(k_x, (N_NODES, IN_CH), jnp.float32)
    src = jax.random.randint(k_src, (N_EDGES,), 0, N_NODES, jnp.int32)
    dst = jax.random.randint(k_dst, (N_EDGES,), 0, N_NODES, jnp.int32)
    edge_index = jnp.stack([src, dst], axis=0)                       # (2, E)
    timestep = jax.random.uniform(k_t, (N_GRAPHS,), jnp.float32) * 10.0
    batch_index = jnp.repeat(jnp.arange(N_GRAPHS, dtype=jnp.int32),
                             N_NODES // N_GRAPHS)                    # (N,)

    fwd = jax.jit(functools.partial(gnn_denoiser_forward, out_channels=OUT_CH))
    out = fwd(kparams, x, edge_index, timestep, batch_index)
    jax.block_until_ready(out)

    assert out.shape == (N_NODES, OUT_CH)
    assert out.dtype == jnp.float32
    assert bool(jnp.all(jnp.isfinite(out)))
    print("KERNEL_OK")
</pallas_src>

<mosaic_0001>
module attributes {stable_mosaic.version = 11 : i64} {
  func.func @_encode_kernel(%arg0: i32, %arg1: memref<16x128xbf16, #tpu.memory_space<vmem>>, %arg2: memref<16x1xf32, #tpu.memory_space<vmem>>, %arg3: memref<128x128xbf16, #tpu.memory_space<vmem>>, %arg4: memref<1x128xf32, #tpu.memory_space<vmem>>, %arg5: memref<128x128xbf16, #tpu.memory_space<vmem>>, %arg6: memref<1x128xf32, #tpu.memory_space<vmem>>, %arg7: memref<1x128xf32, #tpu.memory_space<vmem>>, %arg8: memref<1x128xf32, #tpu.memory_space<vmem>>, %arg9: memref<16x128xbf16, #tpu.memory_space<vmem>>) attributes {dimension_semantics = [#tpu.dimension_semantics<parallel>], iteration_bounds = array<i64: 1>, scalar_prefetch = 0 : i64, scratch_operands = 0 : i64, tpu.core_type = #tpu.core_type<tc>, window_params = [{transform_indices = @transform_0, window_bounds = array<i64: 16, 128>}, {transform_indices = @transform_1, window_bounds = array<i64: 16, 1>}, {pipeline_mode = #tpu.pipeline_mode<synchronous>, transform_indices = @transform_2, window_bounds = array<i64: 128, 128>}, {pipeline_mode = #tpu.pipeline_mode<synchronous>, transform_indices = @transform_3, window_bounds = array<i64: 1, 128>}, {pipeline_mode = #tpu.pipeline_mode<synchronous>, transform_indices = @transform_4, window_bounds = array<i64: 128, 128>}, {pipeline_mode = #tpu.pipeline_mode<synchronous>, transform_indices = @transform_5, window_bounds = array<i64: 1, 128>}, {pipeline_mode = #tpu.pipeline_mode<synchronous>, transform_indices = @transform_6, window_bounds = array<i64: 1, 128>}, {pipeline_mode = #tpu.pipeline_mode<synchronous>, transform_indices = @transform_7, window_bounds = array<i64: 1, 128>}, {transform_indices = @transform_8, window_bounds = array<i64: 16, 128>}]} {
    %c0 = arith.constant 0 : index
    %c0_0 = arith.constant 0 : index
    %0 = vector.load %arg1[%c0, %c0_0] : memref<16x128xbf16, #tpu.memory_space<vmem>>, vector<16x128xbf16>
    %c0_1 = arith.constant 0 : index
    %c0_2 = arith.constant 0 : index
    %1 = vector.load %arg3[%c0_1, %c0_2] : memref<128x128xbf16, #tpu.memory_space<vmem>>, vector<128x128xbf16>
    %cst = arith.constant dense<0.000000e+00> : vector<16x128xf32>
    %2 = tpu.matmul %0, %1, %cst {dimension_numbers = #tpu.dot_dimension_numbers<[1], [0], [0], [1], [0, 0, 1, 1], [], []>} : vector<16x128xbf16>, vector<128x128xbf16>, vector<16x128xf32> -> vector<16x128xf32>
    %c0_3 = arith.constant 0 : index
    %c0_4 = arith.constant 0 : index
    %3 = vector.load %arg4[%c0_3, %c0_4] : memref<1x128xf32, #tpu.memory_space<vmem>>, vector<1x128xf32>
    %4 = vector.broadcast %3 : vector<1x128xf32> to vector<16x128xf32>
    %5 = arith.addf %2, %4 : vector<16x128xf32>
    %cst_5 = arith.constant 0.000000e+00 : f32
    %6 = vector.broadcast %cst_5 : f32 to vector<16x128xf32>
    %7 = arith.maximumf %5, %6 : vector<16x128xf32>
    %8 = arith.truncf %7 : vector<16x128xf32> to vector<16x128xbf16>
    %c0_6 = arith.constant 0 : index
    %c0_7 = arith.constant 0 : index
    %9 = vector.load %arg5[%c0_6, %c0_7] : memref<128x128xbf16, #tpu.memory_space<vmem>>, vector<128x128xbf16>
    %cst_8 = arith.constant dense<0.000000e+00> : vector<16x128xf32>
    %10 = tpu.matmul %8, %9, %cst_8 {dimension_numbers = #tpu.dot_dimension_numbers<[1], [0], [0], [1], [0, 0, 1, 1], [], []>} : vector<16x128xbf16>, vector<128x128xbf16>, vector<16x128xf32> -> vector<16x128xf32>
    %c0_9 = arith.constant 0 : index
    %c0_10 = arith.constant 0 : index
    %11 = vector.load %arg6[%c0_9, %c0_10] : memref<1x128xf32, #tpu.memory_space<vmem>>, vector<1x128xf32>
    %12 = vector.broadcast %11 : vector<1x128xf32> to vector<16x128xf32>
    %13 = arith.addf %10, %12 : vector<16x128xf32>
    %c0_11 = arith.constant 0 : index
    %c0_12 = arith.constant 0 : index
    %14 = vector.load %arg2[%c0_11, %c0_12] : memref<16x1xf32, #tpu.memory_space<vmem>>, vector<16x1xf32>
    %c0_13 = arith.constant 0 : index
    %c0_14 = arith.constant 0 : index
    %15 = vector.load %arg7[%c0_13, %c0_14] : memref<1x128xf32, #tpu.memory_space<vmem>>, vector<1x128xf32>
    %16 = vector.broadcast %14 : vector<16x1xf32> to vector<16x128xf32>
    %17 = vector.broadcast %15 : vector<1x128xf32> to vector<16x128xf32>
    %18 = arith.mulf %16, %17 : vector<16x128xf32>
    %c0_15 = arith.constant 0 : index
    %c0_16 = arith.constant 0 : index
    %19 = vector.load %arg8[%c0_15, %c0_16] : memref<1x128xf32, #tpu.memory_space<vmem>>, vector<1x128xf32>
    %20 = vector.broadcast %19 : vector<1x128xf32> to vector<16x128xf32>
    %21 = arith.addf %18, %20 : vector<16x128xf32>
    %cst_17 = arith.constant 0.000000e+00 : f32
    %22 = vector.broadcast %cst_17 : f32 to vector<16x128xf32>
    %23 = arith.maximumf %21, %22 : vector<16x128xf32>
    %24 = arith.addf %13, %23 : vector<16x128xf32>
    %25 = arith.truncf %24 : vector<16x128xf32> to vector<16x128xbf16>
    %c0_18 = arith.constant 0 : index
    %c0_19 = arith.constant 0 : index
    %26 = vector.load %arg9[%c0_18, %c0_19] : memref<16x128xbf16, #tpu.memory_space<vmem>>, vector<16x128xbf16>
    tpu.vector_store %arg9[%c0_18, %c0_19], %25 {strides = array<i32>} : memref<16x128xbf16, #tpu.memory_space<vmem>>, vector<16x128xbf16>,
    return
  }
  func.func @transform_0(%arg0: i32) -> (i32, i32) {
    %c0_i32 = arith.constant 0 : i32
    %c0_i32_0 = arith.constant 0 : i32
    return %arg0, %c0_i32 : i32, i32
  }
  func.func @transform_1(%arg0: i32) -> (i32, i32) {
    %c0_i32 = arith.constant 0 : i32
    %c0_i32_0 = arith.constant 0 : i32
    return %arg0, %c0_i32 : i32, i32
  }
  func.func @transform_2(%arg0: i32) -> (i32, i32) {
    %c0_i32 = arith.constant 0 : i32
    %c0_i32_0 = arith.constant 0 : i32
    %c0_i32_1 = arith.constant 0 : i32
    return %c0_i32, %c0_i32_0 : i32, i32
  }
  func.func @transform_3(%arg0: i32) -> (i32, i32) {
    %c0_i32 = arith.constant 0 : i32
    %c0_i32_0 = arith.constant 0 : i32
    %c0_i32_1 = arith.constant 0 : i32
    return %c0_i32, %c0_i32_0 : i32, i32
  }
  func.func @transform_4(%arg0: i32) -> (i32, i32) {
    %c0_i32 = arith.constant 0 : i32
    %c0_i32_0 = arith.constant 0 : i32
    %c0_i32_1 = arith.constant 0 : i32
    return %c0_i32, %c0_i32_0 : i32, i32
  }
  func.func @transform_5(%arg0: i32) -> (i32, i32) {
    %c0_i32 = arith.constant 0 : i32
    %c0_i32_0 = arith.constant 0 : i32
    %c0_i32_1 = arith.constant 0 : i32
    return %c0_i32, %c0_i32_0 : i32, i32
  }
  func.func @transform_6(%arg0: i32) -> (i32, i32) {
    %c0_i32 = arith.constant 0 : i32
    %c0_i32_0 = arith.constant 0 : i32
    %c0_i32_1 = arith.constant 0 : i32
    return %c0_i32, %c0_i32_0 : i32, i32
  }
  func.func @transform_7(%arg0: i32) -> (i32, i32) {
    %c0_i32 = arith.constant 0 : i32
    %c0_i32_0 = arith.constant 0 : i32
    %c0_i32_1 = arith.constant 0 : i32
    return %c0_i32, %c0_i32_0 : i32, i32
  }
  func.func @transform_8(%arg0: i32) -> (i32, i32) {
    %c0_i32 = arith.constant 0 : i32
    %c0_i32_0 = arith.constant 0 : i32
    return %arg0, %c0_i32 : i32, i32
  }
}

module attributes {stable_mosaic.version = 11 : i64} {
  func.func @_obj_decode_kernel(%arg0: i32, %arg1: memref<16x128xbf16, #tpu.memory_space<vmem>>, %arg2: memref<16x128xf32, #tpu.memory_space<vmem>>, %arg3: memref<128x128xbf16, #tpu.memory_space<vmem>>, %arg4: memref<128x128xbf16, #tpu.memory_space<vmem>>, %arg5: memref<1x128xf32, #tpu.memory_space<vmem>>, %arg6: memref<128x128xbf16, #tpu.memory_space<vmem>>, %arg7: memref<1x128xf32, #tpu.memory_space<vmem>>, %arg8: memref<128x128xbf16, #tpu.memory_space<vmem>>, %arg9: memref<1x128xf32, #tpu.memory_space<vmem>>, %arg10: memref<128x128xbf16, #tpu.memory_space<vmem>>, %arg11: memref<1x128xf32, #tpu.memory_space<vmem>>, %arg12: memref<16x128xf32, #tpu.memory_space<vmem>>) attributes {dimension_semantics = [#tpu.dimension_semantics<parallel>], iteration_bounds = array<i64: 1>, scalar_prefetch = 0 : i64, scratch_operands = 0 : i64, tpu.core_type = #tpu.core_type<tc>, window_params = [{transform_indices = @transform_0, window_bounds = array<i64: 16, 128>}, {transform_indices = @transform_1, window_bounds = array<i64: 16, 128>}, {pipeline_mode = #tpu.pipeline_mode<synchronous>, transform_indices = @transform_2, window_bounds = array<i64: 128, 128>}, {pipeline_mode = #tpu.pipeline_mode<synchronous>, transform_indices = @transform_3, window_bounds = array<i64: 128, 128>}, {pipeline_mode = #tpu.pipeline_mode<synchronous>, transform_indices = @transform_4, window_bounds = array<i64: 1, 128>}, {pipeline_mode = #tpu.pipeline_mode<synchronous>, transform_indices = @transform_5, window_bounds = array<i64: 128, 128>}, {pipeline_mode = #tpu.pipeline_mode<synchronous>, transform_indices = @transform_6, window_bounds = array<i64: 1, 128>}, {pipeline_mode = #tpu.pipeline_mode<synchronous>, transform_indices = @transform_7, window_bounds = array<i64: 128, 128>}, {pipeline_mode = #tpu.pipeline_mode<synchronous>, transform_indices = @transform_8, window_bounds = array<i64: 1, 128>}, {pipeline_mode = #tpu.pipeline_mode<synchronous>, transform_indices = @transform_9, window_bounds = array<i64: 128, 128>}, {pipeline_mode = #tpu.pipeline_mode<synchronous>, transform_indices = @transform_10, window_bounds = array<i64: 1, 128>}, {transform_indices = @transform_11, window_bounds = array<i64: 16, 128>}]} {
    %c0 = arith.constant 0 : index
    %c0_0 = arith.constant 0 : index
    %0 = vector.load %arg1[%c0, %c0_0] : memref<16x128xbf16, #tpu.memory_space<vmem>>, vector<16x128xbf16>
    %c0_1 = arith.constant 0 : index
    %c0_2 = arith.constant 0 : index
    %1 = vector.load %arg3[%c0_1, %c0_2] : memref<128x128xbf16, #tpu.memory_space<vmem>>, vector<128x128xbf16>
    %cst = arith.constant dense<0.000000e+00> : vector<16x128xf32>
    %2 = tpu.matmul %0, %1, %cst {dimension_numbers = #tpu.dot_dimension_numbers<[1], [0], [0], [1], [0, 0, 1, 1], [], []>} : vector<16x128xbf16>, vector<128x128xbf16>, vector<16x128xf32> -> vector<16x128xf32>
    %c0_3 = arith.constant 0 : index
    %c0_4 = arith.constant 0 : index
    %3 = vector.load %arg2[%c0_3, %c0_4] : memref<16x128xf32, #tpu.memory_space<vmem>>, vector<16x128xf32>
    %4 = arith.truncf %3 : vector<16x128xf32> to vector<16x128xbf16>
    %c0_5 = arith.constant 0 : index
    %c0_6 = arith.constant 0 : index
    %5 = vector.load %arg4[%c0_5, %c0_6] : memref<128x128xbf16, #tpu.memory_space<vmem>>, vector<128x128xbf16>
    %cst_7 = arith.constant dense<0.000000e+00> : vector<16x128xf32>
    %6 = tpu.matmul %4, %5, %cst_7 {dimension_numbers = #tpu.dot_dimension_numbers<[1], [0], [0], [1], [0, 0, 1, 1], [], []>} : vector<16x128xbf16>, vector<128x128xbf16>, vector<16x128xf32> -> vector<16x128xf32>
    %7 = arith.addf %2, %6 : vector<16x128xf32>
    %c0_8 = arith.constant 0 : index
    %c0_9 = arith.constant 0 : index
    %8 = vector.load %arg5[%c0_8, %c0_9] : memref<1x128xf32, #tpu.memory_space<vmem>>, vector<1x128xf32>
    %9 = vector.broadcast %8 : vector<1x128xf32> to vector<16x128xf32>
    %10 = arith.addf %7, %9 : vector<16x128xf32>
    %cst_10 = arith.constant 0.000000e+00 : f32
    %11 = vector.broadcast %cst_10 : f32 to vector<16x128xf32>
    %12 = arith.maximumf %10, %11 : vector<16x128xf32>
    %13 = arith.truncf %12 : vector<16x128xf32> to vector<16x128xbf16>
    %c0_11 = arith.constant 0 : index
    %c0_12 = arith.constant 0 : index
    %14 = vector.load %arg6[%c0_11, %c0_12] : memref<128x128xbf16, #tpu.memory_space<vmem>>, vector<128x128xbf16>
    %cst_13 = arith.constant dense<0.000000e+00> : vector<16x128xf32>
    %15 = tpu.matmul %13, %14, %cst_13 {dimension_numbers = #tpu.dot_dimension_numbers<[1], [0], [0], [1], [0, 0, 1, 1], [], []>} : vector<16x128xbf16>, vector<128x128xbf16>, vector<16x128xf32> -> vector<16x128xf32>
    %c0_14 = arith.constant 0 : index
    %c0_15 = arith.constant 0 : index
    %16 = vector.load %arg7[%c0_14, %c0_15] : memref<1x128xf32, #tpu.memory_space<vmem>>, vector<1x128xf32>
    %17 = vector.broadcast %16 : vector<1x128xf32> to vector<16x128xf32>
    %18 = arith.addf %15, %17 : vector<16x128xf32>
    %19 = arith.truncf %18 : vector<16x128xf32> to vector<16x128xbf16>
    %c0_16 = arith.constant 0 : index
    %c0_17 = arith.constant 0 : index
    %20 = vector.load %arg8[%c0_16, %c0_17] : memref<128x128xbf16, #tpu.memory_space<vmem>>, vector<128x128xbf16>
    %cst_18 = arith.constant dense<0.000000e+00> : vector<16x128xf32>
    %21 = tpu.matmul %19, %20, %cst_18 {dimension_numbers = #tpu.dot_dimension_numbers<[1], [0], [0], [1], [0, 0, 1, 1], [], []>} : vector<16x128xbf16>, vector<128x128xbf16>, vector<16x128xf32> -> vector<16x128xf32>
    %c0_19 = arith.constant 0 : index
    %c0_20 = arith.constant 0 : index
    %22 = vector.load %arg9[%c0_19, %c0_20] : memref<1x128xf32, #tpu.memory_space<vmem>>, vector<1x128xf32>
    %23 = vector.broadcast %22 : vector<1x128xf32> to vector<16x128xf32>
    %24 = arith.addf %21, %23 : vector<16x128xf32>
    %cst_21 = arith.constant 0.000000e+00 : f32
    %25 = vector.broadcast %cst_21 : f32 to vector<16x128xf32>
    %26 = arith.maximumf %24, %25 : vector<16x128xf32>
    %27 = arith.truncf %26 : vector<16x128xf32> to vector<16x128xbf16>
    %c0_22 = arith.constant 0 : index
    %c0_23 = arith.constant 0 : index
    %28 = vector.load %arg10[%c0_22, %c0_23] : memref<128x128xbf16, #tpu.memory_space<vmem>>, vector<128x128xbf16>
    %cst_24 = arith.constant dense<0.000000e+00> : vector<16x128xf32>
    %29 = tpu.matmul %27, %28, %cst_24 {dimension_numbers = #tpu.dot_dimension_numbers<[1], [0], [0], [1], [0, 0, 1, 1], [], []>} : vector<16x128xbf16>, vector<128x128xbf16>, vector<16x128xf32> -> vector<16x128xf32>
    %c0_25 = arith.constant 0 : index
    %c0_26 = arith.constant 0 : index
    %30 = vector.load %arg11[%c0_25, %c0_26] : memref<1x128xf32, #tpu.memory_space<vmem>>, vector<1x128xf32>
    %31 = vector.broadcast %30 : vector<1x128xf32> to vector<16x128xf32>
    %32 = arith.addf %29, %31 : vector<16x128xf32>
    %c0_27 = arith.constant 0 : index
    %c0_28 = arith.constant 0 : index
    %33 = vector.load %arg12[%c0_27, %c0_28] : memref<16x128xf32, #tpu.memory_space<vmem>>, vector<16x128xf32>
    tpu.vector_store %arg12[%c0_27, %c0_28], %32 {strides = array<i32>} : memref<16x128xf32, #tpu.memory_space<vmem>>, vector<16x128xf32>,
    return
  }
  func.func @transform_0(%arg0: i32) -> (i32, i32) {
    %c0_i32 = arith.constant 0 : i32
    %c0_i32_0 = arith.constant 0 : i32
    return %arg0, %c0_i32 : i32, i32
  }
  func.func @transform_1(%arg0: i32) -> (i32, i32) {
    %c0_i32 = arith.constant 0 : i32
    %c0_i32_0 = arith.constant 0 : i32
    return %arg0, %c0_i32 : i32, i32
  }
  func.func @transform_2(%arg0: i32) -> (i32, i32) {
    %c0_i32 = arith.constant 0 : i32
    %c0_i32_0 = arith.constant 0 : i32
    %c0_i32_1 = arith.constant 0 : i32
    return %c0_i32, %c0_i32_0 : i32, i32
  }
  func.func @transform_3(%arg0: i32) -> (i32, i32) {
    %c0_i32 = arith.constant 0 : i32
    %c0_i32_0 = arith.constant 0 : i32
    %c0_i32_1 = arith.constant 0 : i32
    return %c0_i32, %c0_i32_0 : i32, i32
  }
  func.func @transform_4(%arg0: i32) -> (i32, i32) {
    %c0_i32 = arith.constant 0 : i32
    %c0_i32_0 = arith.constant 0 : i32
    %c0_i32_1 = arith.constant 0 : i32
    return %c0_i32, %c0_i32_0 : i32, i32
  }
  func.func @transform_5(%arg0: i32) -> (i32, i32) {
    %c0_i32 = arith.constant 0 : i32
    %c0_i32_0 = arith.constant 0 : i32
    %c0_i32_1 = arith.constant 0 : i32
    return %c0_i32, %c0_i32_0 : i32, i32
  }
  func.func @transform_6(%arg0: i32) -> (i32, i32) {
    %c0_i32 = arith.constant 0 : i32
    %c0_i32_0 = arith.constant 0 : i32
    %c0_i32_1 = arith.constant 0 : i32
    return %c0_i32, %c0_i32_0 : i32, i32
  }
  func.func @transform_7(%arg0: i32) -> (i32, i32) {
    %c0_i32 = arith.constant 0 : i32
    %c0_i32_0 = arith.constant 0 : i32
    %c0_i32_1 = arith.constant 0 : i32
    return %c0_i32, %c0_i32_0 : i32, i32
  }
  func.func @transform_8(%arg0: i32) -> (i32, i32) {
    %c0_i32 = arith.constant 0 : i32
    %c0_i32_0 = arith.constant 0 : i32
    %c0_i32_1 = arith.constant 0 : i32
    return %c0_i32, %c0_i32_0 : i32, i32
  }
  func.func @transform_9(%arg0: i32) -> (i32, i32) {
    %c0_i32 = arith.constant 0 : i32
    %c0_i32_0 = arith.constant 0 : i32
    %c0_i32_1 = arith.constant 0 : i32
    return %c0_i32, %c0_i32_0 : i32, i32
  }
  func.func @transform_10(%arg0: i32) -> (i32, i32) {
    %c0_i32 = arith.constant 0 : i32
    %c0_i32_0 = arith.constant 0 : i32
    %c0_i32_1 = arith.constant 0 : i32
    return %c0_i32, %c0_i32_0 : i32, i32
  }
  func.func @transform_11(%arg0: i32) -> (i32, i32) {
    %c0_i32 = arith.constant 0 : i32
    %c0_i32_0 = arith.constant 0 : i32
    return %arg0, %c0_i32 : i32, i32
  }
}

module attributes {stable_mosaic.version = 11 : i64} {
  func.func @_edge_kernel(%arg0: i32, %arg1: memref<32xi32, #tpu.memory_space<smem>>, %arg2: memref<32x128xbf16, #tpu.memory_space<vmem>>, %arg3: memref<32x128xbf16, #tpu.memory_space<vmem>>, %arg4: memref<128x128xbf16, #tpu.memory_space<vmem>>, %arg5: memref<128x128xbf16, #tpu.memory_space<vmem>>, %arg6: memref<1x128xf32, #tpu.memory_space<vmem>>, %arg7: memref<128x128xbf16, #tpu.memory_space<vmem>>, %arg8: memref<1x128xf32, #tpu.memory_space<vmem>>, %arg9: memref<16x128xf32, #tpu.memory_space<vmem>>, %arg10: memref<32x128xf32, #tpu.memory_space<vmem>>) attributes {dimension_semantics = [#tpu.dimension_semantics<arbitrary>], iteration_bounds = array<i64: 1>, scalar_prefetch = 1 : i64, scratch_operands = 1 : i64, tpu.core_type = #tpu.core_type<tc>, window_params = [{transform_indices = @transform_0, window_bounds = array<i64: 32, 128>}, {transform_indices = @transform_1, window_bounds = array<i64: 32, 128>}, {pipeline_mode = #tpu.pipeline_mode<synchronous>, transform_indices = @transform_2, window_bounds = array<i64: 128, 128>}, {pipeline_mode = #tpu.pipeline_mode<synchronous>, transform_indices = @transform_3, window_bounds = array<i64: 128, 128>}, {pipeline_mode = #tpu.pipeline_mode<synchronous>, transform_indices = @transform_4, window_bounds = array<i64: 1, 128>}, {pipeline_mode = #tpu.pipeline_mode<synchronous>, transform_indices = @transform_5, window_bounds = array<i64: 128, 128>}, {pipeline_mode = #tpu.pipeline_mode<synchronous>, transform_indices = @transform_6, window_bounds = array<i64: 1, 128>}, {pipeline_mode = #tpu.pipeline_mode<synchronous>, transform_indices = @transform_7, window_bounds = array<i64: 16, 128>}]} {
    %c0_i32 = arith.constant 0 : i32
    %0 = arith.cmpi eq, %arg0, %c0_i32 : i32
    %1 = arith.extui %0 : i1 to i32
    %c0_i32_0 = arith.constant 0 : i32
    %2 = arith.cmpi ne, %1, %c0_i32_0 : i32
    scf.if %2 {
      %cst_25 = arith.constant 0.000000e+00 : f32
      %33 = vector.broadcast %cst_25 : f32 to vector<16x128xf32>
      %c0_26 = arith.constant 0 : index
      %c0_27 = arith.constant 0 : index
      %34 = vector.load %arg9[%c0_26, %c0_27] : memref<16x128xf32, #tpu.memory_space<vmem>>, vector<16x128xf32>
      tpu.vector_store %arg9[%c0_26, %c0_27], %33 {strides = array<i32>} : memref<16x128xf32, #tpu.memory_space<vmem>>, vector<16x128xf32>,
    } else {
    }
    %c0 = arith.constant 0 : index
    %c0_1 = arith.constant 0 : index
    %3 = vector.load %arg2[%c0, %c0_1] : memref<32x128xbf16, #tpu.memory_space<vmem>>, vector<32x128xbf16>
    %c0_2 = arith.constant 0 : index
    %c0_3 = arith.constant 0 : index
    %4 = vector.load %arg4[%c0_2, %c0_3] : memref<128x128xbf16, #tpu.memory_space<vmem>>, vector<128x128xbf16>
    %cst = arith.constant dense<0.000000e+00> : vector<32x128xf32>
    %5 = tpu.matmul %3, %4, %cst {dimension_numbers = #tpu.dot_dimension_numbers<[1], [0], [0], [1], [0, 0, 1, 1], [], []>} : vector<32x128xbf16>, vector<128x128xbf16>, vector<32x128xf32> -> vector<32x128xf32>
    %c0_4 = arith.constant 0 : index
    %c0_5 = arith.constant 0 : index
    %6 = vector.load %arg3[%c0_4, %c0_5] : memref<32x128xbf16, #tpu.memory_space<vmem>>, vector<32x128xbf16>
    %c0_6 = arith.constant 0 : index
    %c0_7 = arith.constant 0 : index
    %7 = vector.load %arg5[%c0_6, %c0_7] : memref<128x128xbf16, #tpu.memory_space<vmem>>, vector<128x128xbf16>
    %cst_8 = arith.constant dense<0.000000e+00> : vector<32x128xf32>
    %8 = tpu.matmul %6, %7, %cst_8 {dimension_numbers = #tpu.dot_dimension_numbers<[1], [0], [0], [1], [0, 0, 1, 1], [], []>} : vector<32x128xbf16>, vector<128x128xbf16>, vector<32x128xf32> -> vector<32x128xf32>
    %9 = arith.addf %5, %8 : vector<32x128xf32>
    %c0_9 = arith.constant 0 : index
    %c0_10 = arith.constant 0 : index
    %10 = vector.load %arg6[%c0_9, %c0_10] : memref<1x128xf32, #tpu.memory_space<vmem>>, vector<1x128xf32>
    %11 = vector.broadcast %10 : vector<1x128xf32> to vector<32x128xf32>
    %12 = arith.addf %9, %11 : vector<32x128xf32>
    %cst_11 = arith.constant 0.000000e+00 : f32
    %13 = vector.broadcast %cst_11 : f32 to vector<32x128xf32>
    %14 = arith.maximumf %12, %13 : vector<32x128xf32>
    %15 = arith.truncf %14 : vector<32x128xf32> to vector<32x128xbf16>
    %c0_12 = arith.constant 0 : index
    %c0_13 = arith.constant 0 : index
    %16 = vector.load %arg7[%c0_12, %c0_13] : memref<128x128xbf16, #tpu.memory_space<vmem>>, vector<128x128xbf16>
    %cst_14 = arith.constant dense<0.000000e+00> : vector<32x128xf32>
    %17 = tpu.matmul %15, %16, %cst_14 {dimension_numbers = #tpu.dot_dimension_numbers<[1], [0], [0], [1], [0, 0, 1, 1], [], []>} : vector<32x128xbf16>, vector<128x128xbf16>, vector<32x128xf32> -> vector<32x128xf32>
    %c0_15 = arith.constant 0 : index
    %c0_16 = arith.constant 0 : index
    %18 = vector.load %arg8[%c0_15, %c0_16] : memref<1x128xf32, #tpu.memory_space<vmem>>, vector<1x128xf32>
    %19 = vector.broadcast %18 : vector<1x128xf32> to vector<32x128xf32>
    %20 = arith.addf %17, %19 : vector<32x128xf32>
    %cst_17 = arith.constant 0.000000e+00 : f32
    %21 = vector.broadcast %cst_17 : f32 to vector<32x128xf32>
    %22 = arith.maximumf %20, %21 : vector<32x128xf32>
    %c32_i32 = arith.constant 32 : i32
    %23 = arith.muli %arg0, %c32_i32 : i32
    %24 = tpu.iota {dimensions = array<i32: 0>} : vector<32x128xi32>
    %25 = vector.broadcast %23 : i32 to vector<32x128xi32>
    %26 = arith.addi %24, %25 : vector<32x128xi32>
    %c32_i32_18 = arith.constant 32 : i32
    %27 = vector.broadcast %c32_i32_18 : i32 to vector<32x128xi32>
    %28 = arith.cmpi slt, %26, %27 : vector<32x128xi32>
    %cst_19 = arith.constant 0.000000e+00 : f32
    %29 = vector.broadcast %cst_19 : f32 to vector<32x128xf32>
    %30 = arith.select %28, %22, %29 : vector<32x128xi1>, vector<32x128xf32>
    %c0_20 = arith.constant 0 : index
    %c0_21 = arith.constant 0 : index
    %31 = vector.load %arg10[%c0_20, %c0_21] : memref<32x128xf32, #tpu.memory_space<vmem>>, vector<32x128xf32>
    tpu.vector_store %arg10[%c0_20, %c0_21], %30 {strides = array<i32>} : memref<32x128xf32, #tpu.memory_space<vmem>>, vector<32x128xf32>,
    %c0_i32_22 = arith.constant 0 : i32
    %c32_i32_23 = arith.constant 32 : i32
    %32 = arith.addi %c0_i32_22, %c32_i32_23 : i32
    %c1_i32 = arith.constant 1 : i32
    scf.for %arg11 = %c0_i32_22 to %32 step %c1_i32  : i32 {
      %33 = arith.addi %23, %arg11 : i32
      %34 = arith.index_cast %33 : i32 to index
      %35 = memref.load %arg1[%34] : memref<32xi32, #tpu.memory_space<smem>>
      %36 = arith.index_cast %35 : i32 to index
      %c0_25 = arith.constant 0 : index
      %37 = vector.load %arg9[%36, %c0_25] : memref<16x128xf32, #tpu.memory_space<vmem>>, vector<1x128xf32>
      %38 = arith.index_cast %arg11 : i32 to index
      %c0_26 = arith.constant 0 : index
      %39 = vector.load %arg10[%38, %c0_26] : memref<32x128xf32, #tpu.memory_space<vmem>>, vector<1x128xf32>
      %40 = arith.addf %37, %39 : vector<1x128xf32>
      %41 = arith.index_cast %35 : i32 to index
      %c0_27 = arith.constant 0 : index
      %42 = vector.load %arg9[%41, %c0_27] : memref<16x128xf32, #tpu.memory_space<vmem>>, vector<1x128xf32>
      tpu.vector_store %arg9[%41, %c0_27], %40 {strides = array<i32>} : memref<16x128xf32, #tpu.memory_space<vmem>>, vector<1x128xf32>,
    }
    %c32_i32_24 = arith.constant 32 : i32
    return
  }
  func.func @transform_0(%arg0: i32, %arg1: memref<32xi32, #tpu.memory_space<smem>>) -> (i32, i32) {
    %c0_i32 = arith.constant 0 : i32
    %c0_i32_0 = arith.constant 0 : i32
    return %arg0, %c0_i32 : i32, i32
  }
  func.func @transform_1(%arg0: i32, %arg1: memref<32xi32, #tpu.memory_space<smem>>) -> (i32, i32) {
    %c0_i32 = arith.constant 0 : i32
    %c0_i32_0 = arith.constant 0 : i32
    return %arg0, %c0_i32 : i32, i32
  }
  func.func @transform_2(%arg0: i32, %arg1: memref<32xi32, #tpu.memory_space<smem>>) -> (i32, i32) {
    %c0_i32 = arith.constant 0 : i32
    %c0_i32_0 = arith.constant 0 : i32
    %c0_i32_1 = arith.constant 0 : i32
    return %c0_i32, %c0_i32_0 : i32, i32
  }
  func.func @transform_3(%arg0: i32, %arg1: memref<32xi32, #tpu.memory_space<smem>>) -> (i32, i32) {
    %c0_i32 = arith.constant 0 : i32
    %c0_i32_0 = arith.constant 0 : i32
    %c0_i32_1 = arith.constant 0 : i32
    return %c0_i32, %c0_i32_0 : i32, i32
  }
  func.func @transform_4(%arg0: i32, %arg1: memref<32xi32, #tpu.memory_space<smem>>) -> (i32, i32) {
    %c0_i32 = arith.constant 0 : i32
    %c0_i32_0 = arith.constant 0 : i32
    %c0_i32_1 = arith.constant 0 : i32
    return %c0_i32, %c0_i32_0 : i32, i32
  }
  func.func @transform_5(%arg0: i32, %arg1: memref<32xi32, #tpu.memory_space<smem>>) -> (i32, i32) {
    %c0_i32 = arith.constant 0 : i32
    %c0_i32_0 = arith.constant 0 : i32
    %c0_i32_1 = arith.constant 0 : i32
    return %c0_i32, %c0_i32_0 : i32, i32
  }
  func.func @transform_6(%arg0: i32, %arg1: memref<32xi32, #tpu.memory_space<smem>>) -> (i32, i32) {
    %c0_i32 = arith.constant 0 : i32
    %c0_i32_0 = arith.constant 0 : i32
    %c0_i32_1 = arith.constant 0 : i32
    return %c0_i32, %c0_i32_0 : i32, i32
  }
  func.func @transform_7(%arg0: i32, %arg1: memref<32xi32, #tpu.memory_space<smem>>) -> (i32, i32) {
    %c0_i32 = arith.constant 0 : i32
    %c0_i32_0 = arith.constant 0 : i32
    %c0_i32_1 = arith.constant 0 : i32
    return %c0_i32, %c0_i32_0 : i32, i32
  }
}

module attributes {stable_mosaic.version = 11 : i64} {
  func.func @_obj_kernel(%arg0: i32, %arg1: memref<16x128xbf16, #tpu.memory_space<vmem>>, %arg2: memref<16x128xf32, #tpu.memory_space<vmem>>, %arg3: memref<128x128xbf16, #tpu.memory_space<vmem>>, %arg4: memref<128x128xbf16, #tpu.memory_space<vmem>>, %arg5: memref<1x128xf32, #tpu.memory_space<vmem>>, %arg6: memref<128x128xbf16, #tpu.memory_space<vmem>>, %arg7: memref<1x128xf32, #tpu.memory_space<vmem>>, %arg8: memref<16x128xbf16, #tpu.memory_space<vmem>>) attributes {dimension_semantics = [#tpu.dimension_semantics<parallel>], iteration_bounds = array<i64: 1>, scalar_prefetch = 0 : i64, scratch_operands = 0 : i64, tpu.core_type = #tpu.core_type<tc>, window_params = [{transform_indices = @transform_0, window_bounds = array<i64: 16, 128>}, {transform_indices = @transform_1, window_bounds = array<i64: 16, 128>}, {pipeline_mode = #tpu.pipeline_mode<synchronous>, transform_indices = @transform_2, window_bounds = array<i64: 128, 128>}, {pipeline_mode = #tpu.pipeline_mode<synchronous>, transform_indices = @transform_3, window_bounds = array<i64: 128, 128>}, {pipeline_mode = #tpu.pipeline_mode<synchronous>, transform_indices = @transform_4, window_bounds = array<i64: 1, 128>}, {pipeline_mode = #tpu.pipeline_mode<synchronous>, transform_indices = @transform_5, window_bounds = array<i64: 128, 128>}, {pipeline_mode = #tpu.pipeline_mode<synchronous>, transform_indices = @transform_6, window_bounds = array<i64: 1, 128>}, {transform_indices = @transform_7, window_bounds = array<i64: 16, 128>}]} {
    %c0 = arith.constant 0 : index
    %c0_0 = arith.constant 0 : index
    %0 = vector.load %arg1[%c0, %c0_0] : memref<16x128xbf16, #tpu.memory_space<vmem>>, vector<16x128xbf16>
    %c0_1 = arith.constant 0 : index
    %c0_2 = arith.constant 0 : index
    %1 = vector.load %arg3[%c0_1, %c0_2] : memref<128x128xbf16, #tpu.memory_space<vmem>>, vector<128x128xbf16>
    %cst = arith.constant dense<0.000000e+00> : vector<16x128xf32>
    %2 = tpu.matmul %0, %1, %cst {dimension_numbers = #tpu.dot_dimension_numbers<[1], [0], [0], [1], [0, 0, 1, 1], [], []>} : vector<16x128xbf16>, vector<128x128xbf16>, vector<16x128xf32> -> vector<16x128xf32>
    %c0_3 = arith.constant 0 : index
    %c0_4 = arith.constant 0 : index
    %3 = vector.load %arg2[%c0_3, %c0_4] : memref<16x128xf32, #tpu.memory_space<vmem>>, vector<16x128xf32>
    %4 = arith.truncf %3 : vector<16x128xf32> to vector<16x128xbf16>
    %c0_5 = arith.constant 0 : index
    %c0_6 = arith.constant 0 : index
    %5 = vector.load %arg4[%c0_5, %c0_6] : memref<128x128xbf16, #tpu.memory_space<vmem>>, vector<128x128xbf16>
    %cst_7 = arith.constant dense<0.000000e+00> : vector<16x128xf32>
    %6 = tpu.matmul %4, %5, %cst_7 {dimension_numbers = #tpu.dot_dimension_numbers<[1], [0], [0], [1], [0, 0, 1, 1], [], []>} : vector<16x128xbf16>, vector<128x128xbf16>, vector<16x128xf32> -> vector<16x128xf32>
    %7 = arith.addf %2, %6 : vector<16x128xf32>
    %c0_8 = arith.constant 0 : index
    %c0_9 = arith.constant 0 : index
    %8 = vector.load %arg5[%c0_8, %c0_9] : memref<1x128xf32, #tpu.memory_space<vmem>>, vector<1x128xf32>
    %9 = vector.broadcast %8 : vector<1x128xf32> to vector<16x128xf32>
    %10 = arith.addf %7, %9 : vector<16x128xf32>
    %cst_10 = arith.constant 0.000000e+00 : f32
    %11 = vector.broadcast %cst_10 : f32 to vector<16x128xf32>
    %12 = arith.maximumf %10, %11 : vector<16x128xf32>
    %13 = arith.truncf %12 : vector<16x128xf32> to vector<16x128xbf16>
    %c0_11 = arith.constant 0 : index
    %c0_12 = arith.constant 0 : index
    %14 = vector.load %arg6[%c0_11, %c0_12] : memref<128x128xbf16, #tpu.memory_space<vmem>>, vector<128x128xbf16>
    %cst_13 = arith.constant dense<0.000000e+00> : vector<16x128xf32>
    %15 = tpu.matmul %13, %14, %cst_13 {dimension_numbers = #tpu.dot_dimension_numbers<[1], [0], [0], [1], [0, 0, 1, 1], [], []>} : vector<16x128xbf16>, vector<128x128xbf16>, vector<16x128xf32> -> vector<16x128xf32>
    %c0_14 = arith.constant 0 : index
    %c0_15 = arith.constant 0 : index
    %16 = vector.load %arg7[%c0_14, %c0_15] : memref<1x128xf32, #tpu.memory_space<vmem>>, vector<1x128xf32>
    %17 = vector.broadcast %16 : vector<1x128xf32> to vector<16x128xf32>
    %18 = arith.addf %15, %17 : vector<16x128xf32>
    %cst_16 = arith.constant 0.000000e+00 : f32
    %19 = vector.broadcast %cst_16 : f32 to vector<16x128xf32>
    %20 = arith.maximumf %18, %19 : vector<16x128xf32>
    %21 = arith.truncf %20 : vector<16x128xf32> to vector<16x128xbf16>
    %c0_17 = arith.constant 0 : index
    %c0_18 = arith.constant 0 : index
    %22 = vector.load %arg8[%c0_17, %c0_18] : memref<16x128xbf16, #tpu.memory_space<vmem>>, vector<16x128xbf16>
    tpu.vector_store %arg8[%c0_17, %c0_18], %21 {strides = array<i32>} : memref<16x128xbf16, #tpu.memory_space<vmem>>, vector<16x128xbf16>,
    return
  }
  func.func @transform_0(%arg0: i32) -> (i32, i32) {
    %c0_i32 = arith.constant 0 : i32
    %c0_i32_0 = arith.constant 0 : i32
    return %arg0, %c0_i32 : i32, i32
  }
  func.func @transform_1(%arg0: i32) -> (i32, i32) {
    %c0_i32 = arith.constant 0 : i32
    %c0_i32_0 = arith.constant 0 : i32
    return %arg0, %c0_i32 : i32, i32
  }
  func.func @transform_2(%arg0: i32) -> (i32, i32) {
    %c0_i32 = arith.constant 0 : i32
    %c0_i32_0 = arith.constant 0 : i32
    %c0_i32_1 = arith.constant 0 : i32
    return %c0_i32, %c0_i32_0 : i32, i32
  }
  func.func @transform_3(%arg0: i32) -> (i32, i32) {
    %c0_i32 = arith.constant 0 : i32
    %c0_i32_0 = arith.constant 0 : i32
    %c0_i32_1 = arith.constant 0 : i32
    return %c0_i32, %c0_i32_0 : i32, i32
  }
  func.func @transform_4(%arg0: i32) -> (i32, i32) {
    %c0_i32 = arith.constant 0 : i32
    %c0_i32_0 = arith.constant 0 : i32
    %c0_i32_1 = arith.constant 0 : i32
    return %c0_i32, %c0_i32_0 : i32, i32
  }
  func.func @transform_5(%arg0: i32) -> (i32, i32) {
    %c0_i32 = arith.constant 0 : i32
    %c0_i32_0 = arith.constant 0 : i32
    %c0_i32_1 = arith.constant 0 : i32
    return %c0_i32, %c0_i32_0 : i32, i32
  }
  func.func @transform_6(%arg0: i32) -> (i32, i32) {
    %c0_i32 = arith.constant 0 : i32
    %c0_i32_0 = arith.constant 0 : i32
    %c0_i32_1 = arith.constant 0 : i32
    return %c0_i32, %c0_i32_0 : i32, i32
  }
  func.func @transform_7(%arg0: i32) -> (i32, i32) {
    %c0_i32 = arith.constant 0 : i32
    %c0_i32_0 = arith.constant 0 : i32
    return %arg0, %c0_i32 : i32, i32
  }
}

</mosaic_0001>

<bundles_post_ra>
// kernel: gnn_denoiser_forward.7
= control target key start
LH: loop header
LB: loop body
LE: loop exit
PB: predicated region body
PF: predicated region fallthrough
CT: control target
= control target key end

     0   :  { %v422_v0 = vmov 0.0   ;;  %vm423_vm0 = vmmov 0   ;;  %v424_v18 = vmov 0   ;;  %s542_s2 = inlined_call_operand.vmem [shape: bf16[128,128], index: 2, kind: input, shape index: {}]   ;;  %s543_s4 = inlined_call_operand.vmem [shape: bf16[128,128], index: 4, kind: input, shape index: {}]   ;;  %s544_s0 = inlined_call_operand.vmem [shape: bf16[16,128], index: 0, kind: input, shape index: {}]   ;;  %s545_s1 = inlined_call_operand.vmem [shape: f32[16,1], index: 1, kind: input, shape index: {}]   ;;  %s546_s3 = inlined_call_operand.vmem [shape: f32[1,128], index: 3, kind: input, shape index: {}]   ;;  %s547_s6 = inlined_call_operand.vmem [shape: f32[1,128], index: 6, kind: input, shape index: {}]   ;;  %s548_s7 = inlined_call_operand.vmem [shape: f32[1,128], index: 7, kind: input, shape index: {}]   ;;  %s549_s5 = inlined_call_operand.vmem [shape: f32[1,128], index: 5, kind: input, shape index: {}]   ;;  %s550_s8 = inlined_call_operand.vmem [shape: bf16[16,128], index: 8, kind: output, shape index: {}]  }
   0x1   :  { %361 = vmatprep.subr.bf16.mxu0 %v422_v0  ;;  %v405_v1 = vld [vmem:[%s542_s2] sm:$0xff]   ;;  %377 = vmatprep.mubr.msk.bf16.mxu0 %vm423_vm0, %v422_v0  ;;  %v406_v2 = vld [vmem:[%s542_s2 + $0x8] sm:$0xff]   ;;  %v407_v3 = vld [vmem:[%s542_s2 + $0x10] sm:$0xff]  }
   0x2   :  { %381 = vmatprep.subr.bf16.mxu1 %v422_v0  ;;  %397 = vmatprep.mubr.msk.bf16.mxu1 %vm423_vm0, %v422_v0  ;;  %v414_v4 = vld [vmem:[%s543_s4] sm:$0xff]   ;;  %v408_v5 = vld [vmem:[%s542_s2 + $0x18] sm:$0xff]   ;;  %v415_v6 = vld [vmem:[%s543_s4 + $0x8] sm:$0xff]  }
   0x3   :  { %362 = vmatpush3.bf16.msra.mxu0 %v405_v1  ;;  %382 = vmatpush3.bf16.msra.mxu1 %v414_v4  ;;  %v409_v7 = vld [vmem:[%s542_s2 + $0x20] sm:$0xff]   ;;  %v416_v8 = vld [vmem:[%s543_s4 + $0x10] sm:$0xff]   ;;  %v410_v9 = vld [vmem:[%s542_s2 + $0x28] sm:$0xff]  }
   0x4   :  { %363 = vmatprep.subr.bf16.mxu0 %v422_v0  ;;  %383 = vmatprep.subr.bf16.mxu1 %v422_v0  ;;  %v417_v10 = vld [vmem:[%s543_s4 + $0x18] sm:$0xff]   ;;  %v411_v11 = vld [vmem:[%s542_s2 + $0x30] sm:$0xff]   ;;  %v418_v12 = vld [vmem:[%s543_s4 + $0x20] sm:$0xff]  }
   0x5   :  { %v412_v13 = vld [vmem:[%s542_s2 + $0x38] sm:$0xff]   ;;  %v419_v14 = vld [vmem:[%s543_s4 + $0x28] sm:$0xff]   ;;  %v413_v15 = vld [vmem:[%s544_s0] sm:$0xff]   ;;  %404 = vset.pattern.permute.xlu0 %v424_v18 }
   0x6   :  { %v420_v16 = vld [vmem:[%s543_s4 + $0x30] sm:$0xff]   ;;  %v421_v17 = vld [vmem:[%s543_s4 + $0x38] sm:$0xff]   ;;  %v265_v19 = vld [vmem:[%s545_s1] sm:$0xff] }
   0x7   :  { %364 = vmatpush3.bf16.msra.mxu0 %v406_v2  ;;  %384 = vmatpush3.bf16.msra.mxu1 %v415_v6  ;;  %v266_v20 = vld [vmem:[%s545_s1 + $0x8] sm:$0xff]  ;;  %v313_v21 = vld [vmem:[%s546_s3] ss:$0 sm:$0xff] }
   0x8   :  { %365 = vmatprep.subr.bf16.mxu0 %v422_v0  ;;  %385 = vmatprep.subr.bf16.mxu1 %v422_v0  ;;  %v332_v32 = vld [vmem:[%s547_s6] ss:$0 sm:$0xff] }
   0x9   :  { %270 = vperm.xlu0 %404, %v265_v19   ;;  %v333_v36 = vld [vmem:[%s548_s7] ss:$0 sm:$0xff] }
   0xa   :  { %v323_v37 = vld [vmem:[%s549_s5] ss:$0 sm:$0xff] }
   0xb   :  { %366 = vmatpush3.bf16.msra.mxu0 %v407_v3  ;;  %386 = vmatpush3.bf16.msra.mxu1 %v416_v8 }
   0xc   :  { %367 = vmatprep.subr.bf16.mxu0 %v422_v0  ;;  %387 = vmatprep.subr.bf16.mxu1 %v422_v0 }
   0xd   :  { %275 = vperm.xlu0 %404, %v266_v20  }
   0xf   :  { %368 = vmatpush3.bf16.msra.mxu0 %v408_v5  ;;  %388 = vmatpush3.bf16.msra.mxu1 %v417_v10 }
  0x10   :  { %369 = vmatprep.subr.bf16.mxu0 %v422_v0  ;;  %389 = vmatprep.subr.bf16.mxu1 %v422_v0 }
  0x13   :  { %370 = vmatpush3.bf16.msra.mxu0 %v409_v7  ;;  %390 = vmatpush3.bf16.msra.mxu1 %v418_v12 }
  0x14   :  { %371 = vmatprep.subr.bf16.mxu0 %v422_v0  ;;  %391 = vmatprep.subr.bf16.mxu1 %v422_v0 }
  0x17   :  { %372 = vmatpush3.bf16.msra.mxu0 %v410_v9  ;;  %392 = vmatpush3.bf16.msra.mxu1 %v419_v14 }
  0x18   :  { %373 = vmatprep.subr.bf16.mxu0 %v422_v0  ;;  %393 = vmatprep.subr.bf16.mxu1 %v422_v0 }
  0x1b   :  { %374 = vmatpush3.bf16.msra.mxu0 %v411_v11  ;;  %394 = vmatpush3.bf16.msra.mxu1 %v420_v16 }
  0x1c   :  { %375 = vmatprep.subr.bf16.mxu0 %v422_v0  ;;  %395 = vmatprep.subr.bf16.mxu1 %v422_v0 }
  0x1f   :  { %376 = vmatpush3.bf16.msra.mxu0 %v412_v13  ;;  %396 = vmatpush3.bf16.msra.mxu1 %v421_v17 }
  0x22   :  { %378 = vmatmul.mubr.bf16.vlgmr.msra.gmra.mrb[0].mxu0 %v413_v15 }
  0x88   :  { %v271_v31 = vpop.permute.xlu0 %270 }
  0x89   :  { %v284_v34 = vmul.f32 %v332_v32, %v271_v31 }
  0x8b   :  { %v293_v38 = vadd.f32 %v333_v36, %v284_v34 }
  0x8c   :  { %v276_v33 = vpop.permute.xlu0 %275 }
  0x8d   :  { %v285_v35 = vmul.f32 %v332_v32, %v276_v33  ;;  %v295_v44 = vmax.f32 %v293_v38, 0.0 }
  0x8f   :  { %v294_v39 = vadd.f32 %v333_v36, %v285_v35 }
  0x91   :  { %v296_v45 = vmax.f32 %v294_v39, 0.0 }
  0xf5   :  { %v143_v22 = vpop.f32.mrb[0].mxu0 }
  0xf6   :  { %v144_v23 = vadd.f32 %v313_v21, %v143_v22  ;;  %v379_v24 = vpop.f32.mrb[1].mxu0 }
  0xf7   :  { %v146_v25 = vpop.f32.mrb[2].mxu0 }
  0xf8   :  { %v147_v26 = vadd.f32 %v313_v21, %v146_v25  ;;  %v380_v27 = vpop.f32.mrb[3].mxu0  ;;  %v150_v28 = vmax.f32 %v144_v23, 0.0 }
  0xfa   :  { %v151_v29 = vmax.f32 %v147_v26, 0.0 }
  0xfc   :  { %v152_v30 = vpack.c.bf16 %v151_v29, %v150_v28 }
  0xfe   :  { %398 = vmatmul.mubr.bf16.vlgmr.msra.gmra.mrb[0].mxu1 %v152_v30 }
 0x1d1   :  { %v258_v40 = vpop.f32.mrb[0].mxu1 }
 0x1d2   :  { %v259_v41 = vadd.f32 %v323_v37, %v258_v40  ;;  %v399_v42 = vpop.f32.mrb[1].mxu1 }
 0x1d3   :  { %v261_v43 = vpop.f32.mrb[2].mxu1 }
 0x1d4   :  { %v262_v46 = vadd.f32 %v323_v37, %v261_v43  ;;  %v400_v47 = vpop.f32.mrb[3].mxu1  ;;  %v297_v48 = vadd.f32 %v295_v44, %v259_v41 }
 0x1d6   :  { %v298_v49 = vadd.f32 %v296_v45, %v262_v46 }
 0x1d8   :  { %v341_v50 = vpack.c.bf16 %v298_v49, %v297_v48 }
 0x1da   :  { %342 = vst [vmem:[%s550_s8] sm:$0xff] %v341_v50  }

// kernel: gnn_denoiser_forward.13
= control target key start
LH: loop header
LB: loop body
LE: loop exit
PB: predicated region body
PF: predicated region fallthrough
CT: control target
= control target key end

     0   :  { %v851_v0 = vmov 0.0   ;;  %vm852_vm0 = vmmov 0   ;;  %s1110_s3 = inlined_call_operand.vmem [shape: bf16[128,128], index: 3, kind: input, shape index: {}]   ;;  %s1111_s2 = inlined_call_operand.vmem [shape: bf16[128,128], index: 2, kind: input, shape index: {}]   ;;  %s1112_s0 = inlined_call_operand.vmem [shape: bf16[16,128], index: 0, kind: input, shape index: {}]   ;;  %s1113_s5 = inlined_call_operand.vmem [shape: bf16[128,128], index: 5, kind: input, shape index: {}]   ;;  %s1114_s1 = inlined_call_operand.vmem [shape: f32[16,128], index: 1, kind: input, shape index: {}]   ;;  %s1115_s7 = inlined_call_operand.vmem [shape: bf16[128,128], index: 7, kind: input, shape index: {}]   ;;  %s1116_s4 = inlined_call_operand.vmem [shape: f32[1,128], index: 4, kind: input, shape index: {}]   ;;  %s1117_s9 = inlined_call_operand.vmem [shape: bf16[128,128], index: 9, kind: input, shape index: {}]   ;;  %s1118_s6 = inlined_call_operand.vmem [shape: f32[1,128], index: 6, kind: input, shape index: {}]   ;;  %s1119_s8 = inlined_call_operand.vmem [shape: f32[1,128], index: 8, kind: input, shape index: {}]   ;;  %s1120_s10 = inlined_call_operand.vmem [shape: f32[1,128], index: 10, kind: input, shape index: {}]   ;;  %s1121_s11 = inlined_call_operand.vmem [shape: f32[16,128], index: 11, kind: output, shape index: {}]  }
   0x1   :  { %708 = vmatprep.subr.bf16.mxu0 %v851_v0  ;;  %728 = vmatprep.subr.bf16.mxu1 %v851_v0  ;;  %v810_v1 = vld [vmem:[%s1110_s3] sm:$0xff]   ;;  %v812_v3 = vld [vmem:[%s1110_s3 + $0x8] sm:$0xff]   ;;  %v814_v5 = vld [vmem:[%s1110_s3 + $0x10] sm:$0xff]  }
   0x2   :  { %v811_v2 = vld [vmem:[%s1111_s2] sm:$0xff]   ;;  %724 = vmatprep.mubr.msk.bf16.mxu0 %vm852_vm0, %v851_v0  ;;  %744 = vmatprep.mubr.msk.bf16.mxu1 %vm852_vm0, %v851_v0  ;;  %v813_v4 = vld [vmem:[%s1111_s2 + $0x8] sm:$0xff]   ;;  %v815_v6 = vld [vmem:[%s1111_s2 + $0x10] sm:$0xff]  }
   0x3   :  { %709 = vmatpush3.bf16.msra.mxu0 %v810_v1  ;;  %729 = vmatpush3.bf16.msra.mxu1 %v811_v2  ;;  %v816_v7 = vld [vmem:[%s1110_s3 + $0x18] sm:$0xff]   ;;  %v818_v9 = vld [vmem:[%s1110_s3 + $0x20] sm:$0xff]   ;;  %v820_v11 = vld [vmem:[%s1110_s3 + $0x28] sm:$0xff]  }
   0x4   :  { %710 = vmatprep.subr.bf16.mxu0 %v851_v0  ;;  %730 = vmatprep.subr.bf16.mxu1 %v851_v0  ;;  %v817_v8 = vld [vmem:[%s1111_s2 + $0x18] sm:$0xff]   ;;  %v819_v10 = vld [vmem:[%s1111_s2 + $0x20] sm:$0xff]   ;;  %v821_v12 = vld [vmem:[%s1111_s2 + $0x28] sm:$0xff]  }
   0x5   :  { %v822_v13 = vld [vmem:[%s1110_s3 + $0x30] sm:$0xff]   ;;  %v824_v15 = vld [vmem:[%s1110_s3 + $0x38] sm:$0xff]   ;;  %v57_v16 = vld [vmem:[%s1114_s1] sm:$0xff] }
   0x6   :  { %v823_v14 = vld [vmem:[%s1111_s2 + $0x30] sm:$0xff]   ;;  %v58_v17 = vld [vmem:[%s1114_s1 + $0x8] sm:$0xff]  ;;  %v825_v18 = vld [vmem:[%s1111_s2 + $0x38] sm:$0xff]  }
   0x7   :  { %711 = vmatpush3.bf16.msra.mxu0 %v812_v3  ;;  %731 = vmatpush3.bf16.msra.mxu1 %v813_v4  ;;  %v59_v19 = vpack.c.bf16 %v58_v17, %v57_v16  ;;  %v826_v20 = vld [vmem:[%s1112_s0] sm:$0xff]   ;;  %v828_v22 = vld [vmem:[%s1113_s5 + $0x8] sm:$0xff]   ;;  %v829_v23 = vld [vmem:[%s1113_s5 + $0x10] sm:$0xff]  }
   0x8   :  { %712 = vmatprep.subr.bf16.mxu0 %v851_v0  ;;  %732 = vmatprep.subr.bf16.mxu1 %v851_v0  ;;  %v827_v21 = vld [vmem:[%s1113_s5] sm:$0xff]   ;;  %v830_v24 = vld [vmem:[%s1113_s5 + $0x18] sm:$0xff]   ;;  %v832_v26 = vld [vmem:[%s1113_s5 + $0x28] sm:$0xff]  }
   0x9   :  { %v831_v25 = vld [vmem:[%s1113_s5 + $0x20] sm:$0xff]   ;;  %v833_v27 = vld [vmem:[%s1113_s5 + $0x30] sm:$0xff]   ;;  %v834_v28 = vld [vmem:[%s1113_s5 + $0x38] sm:$0xff]  }
   0xa   :  { %v835_v29 = vld [vmem:[%s1115_s7] sm:$0xff]   ;;  %v836_v30 = vld [vmem:[%s1115_s7 + $0x8] sm:$0xff]   ;;  %v837_v31 = vld [vmem:[%s1115_s7 + $0x10] sm:$0xff]  }
   0xb   :  { %713 = vmatpush3.bf16.msra.mxu0 %v814_v5  ;;  %733 = vmatpush3.bf16.msra.mxu1 %v815_v6  ;;  %v838_v32 = vld [vmem:[%s1115_s7 + $0x18] sm:$0xff]   ;;  %v839_v33 = vld [vmem:[%s1115_s7 + $0x20] sm:$0xff]   ;;  %v840_v34 = vld [vmem:[%s1115_s7 + $0x28] sm:$0xff]  }
   0xc   :  { %714 = vmatprep.subr.bf16.mxu0 %v851_v0  ;;  %734 = vmatprep.subr.bf16.mxu1 %v851_v0  ;;  %v635_v37 = vld [vmem:[%s1116_s4] ss:$0 sm:$0xff]  ;;  %v841_v51 = vld [vmem:[%s1115_s7 + $0x30] sm:$0xff]   ;;  %v842_v52 = vld [vmem:[%s1115_s7 + $0x38] sm:$0xff]  }
   0xd   :  { %v843_v53 = vld [vmem:[%s1117_s9] sm:$0xff]   ;;  %v844_v54 = vld [vmem:[%s1117_s9 + $0x8] sm:$0xff]   ;;  %v845_v55 = vld [vmem:[%s1117_s9 + $0x10] sm:$0xff]  }
   0xe   :  { %v846_v56 = vld [vmem:[%s1117_s9 + $0x18] sm:$0xff]   ;;  %v847_v57 = vld [vmem:[%s1117_s9 + $0x20] sm:$0xff]   ;;  %v848_v58 = vld [vmem:[%s1117_s9 + $0x28] sm:$0xff]  }
   0xf   :  { %715 = vmatpush3.bf16.msra.mxu0 %v816_v7  ;;  %735 = vmatpush3.bf16.msra.mxu1 %v817_v8  ;;  %v636_v59 = vld [vmem:[%s1118_s6] ss:$0 sm:$0xff]  ;;  %v849_v4 = vld [vmem:[%s1117_s9 + $0x30] sm:$0xff]   ;;  %v850_v5 = vld [vmem:[%s1117_s9 + $0x38] sm:$0xff]  }
  0x10   :  { %716 = vmatprep.subr.bf16.mxu0 %v851_v0  ;;  %736 = vmatprep.subr.bf16.mxu1 %v851_v0  ;;  %v645_v6 = vld [vmem:[%s1119_s8] ss:$0 sm:$0xff] }
  0x13   :  { %717 = vmatpush3.bf16.msra.mxu0 %v818_v9  ;;  %737 = vmatpush3.bf16.msra.mxu1 %v819_v10 }
  0x14   :  { %718 = vmatprep.subr.bf16.mxu0 %v851_v0  ;;  %738 = vmatprep.subr.bf16.mxu1 %v851_v0 }
  0x17   :  { %719 = vmatpush3.bf16.msra.mxu0 %v820_v11  ;;  %739 = vmatpush3.bf16.msra.mxu1 %v821_v12 }
  0x18   :  { %720 = vmatprep.subr.bf16.mxu0 %v851_v0  ;;  %740 = vmatprep.subr.bf16.mxu1 %v851_v0 }
  0x1b   :  { %721 = vmatpush3.bf16.msra.mxu0 %v822_v13  ;;  %741 = vmatpush3.bf16.msra.mxu1 %v823_v14 }
  0x1c   :  { %722 = vmatprep.subr.bf16.mxu0 %v851_v0  ;;  %742 = vmatprep.subr.bf16.mxu1 %v851_v0 }
  0x1f   :  { %723 = vmatpush3.bf16.msra.mxu0 %v824_v15  ;;  %743 = vmatpush3.bf16.msra.mxu1 %v825_v18 }
  0x20   :  { %748 = vmatprep.subr.bf16.mxu0 %v851_v0  ;;  %768 = vmatprep.subr.bf16.mxu1 %v851_v0 }
  0x22   :  { %725 = vmatmul.mubr.bf16.vlgmr.msra.gmra.mrb[0].mxu0 %v59_v19  ;;  %745 = vmatmul.mubr.bf16.vlgmr.msra.gmra.mrb[0].mxu1 %v826_v20 }
  0x23   :  { %749 = vmatpush3.bf16.msra.mxu0 %v827_v21  ;;  %764 = vmatprep.mubr.msk.bf16.mxu0 %vm852_vm0, %v851_v0 }
  0x24   :  { %750 = vmatprep.subr.bf16.mxu0 %v851_v0  ;;  %784 = vmatprep.mubr.msk.bf16.mxu1 %vm852_vm0, %v851_v0 }
  0x25   :  { %769 = vmatpush3.bf16.msra.mxu1 %v835_v29 }
  0x26   :  { %770 = vmatprep.subr.bf16.mxu1 %v851_v0 }
  0x27   :  { %751 = vmatpush3.bf16.msra.mxu0 %v828_v22 }
  0x28   :  { %752 = vmatprep.subr.bf16.mxu0 %v851_v0 }
  0x29   :  { %771 = vmatpush3.bf16.msra.mxu1 %v836_v30 }
  0x2a   :  { %772 = vmatprep.subr.bf16.mxu1 %v851_v0 }
  0x2b   :  { %753 = vmatpush3.bf16.msra.mxu0 %v829_v23 }
  0x2c   :  { %754 = vmatprep.subr.bf16.mxu0 %v851_v0 }
  0x2d   :  { %773 = vmatpush3.bf16.msra.mxu1 %v837_v31 }
  0x2e   :  { %774 = vmatprep.subr.bf16.mxu1 %v851_v0 }
  0x2f   :  { %755 = vmatpush3.bf16.msra.mxu0 %v830_v24 }
  0x30   :  { %756 = vmatprep.subr.bf16.mxu0 %v851_v0 }
  0x31   :  { %775 = vmatpush3.bf16.msra.mxu1 %v838_v32 }
  0x32   :  { %776 = vmatprep.subr.bf16.mxu1 %v851_v0 }
  0x33   :  { %757 = vmatpush3.bf16.msra.mxu0 %v831_v25 }
  0x34   :  { %758 = vmatprep.subr.bf16.mxu0 %v851_v0 }
  0x35   :  { %777 = vmatpush3.bf16.msra.mxu1 %v839_v33 }
  0x36   :  { %778 = vmatprep.subr.bf16.mxu1 %v851_v0 }
  0x37   :  { %759 = vmatpush3.bf16.msra.mxu0 %v832_v26 }
  0x38   :  { %760 = vmatprep.subr.bf16.mxu0 %v851_v0 }
  0x39   :  { %779 = vmatpush3.bf16.msra.mxu1 %v840_v34 }
  0x3a   :  { %780 = vmatprep.subr.bf16.mxu1 %v851_v0 }
  0x3b   :  { %761 = vmatpush3.bf16.msra.mxu0 %v833_v27 }
  0x3c   :  { %762 = vmatprep.subr.bf16.mxu0 %v851_v0 }
  0x3d   :  { %781 = vmatpush3.bf16.msra.mxu1 %v841_v51 }
  0x3e   :  { %782 = vmatprep.subr.bf16.mxu1 %v851_v0 }
  0x3f   :  { %763 = vmatpush3.bf16.msra.mxu0 %v834_v28 }
  0x40   :  { %788 = vmatprep.subr.bf16.mxu0 %v851_v0 }
  0x41   :  { %783 = vmatpush3.bf16.msra.mxu1 %v842_v52 }
  0xf5   :  { %v158_v35 = vpop.f32.mrb[0].mxu0  ;;  %v253_v36 = vpop.f32.mrb[0].mxu1 }
  0xf6   :  { %v726_v38 = vpop.f32.mrb[1].mxu0  ;;  %v254_v39 = vadd.f32 %v253_v36, %v158_v35  ;;  %v746_v40 = vpop.f32.mrb[1].mxu1 }
  0xf7   :  { %v161_v41 = vpop.f32.mrb[2].mxu0  ;;  %v256_v42 = vpop.f32.mrb[2].mxu1 }
  0xf8   :  { %v727_v43 = vpop.f32.mrb[3].mxu0  ;;  %v267_v44 = vadd.f32 %v635_v37, %v254_v39  ;;  %v257_v45 = vadd.f32 %v256_v42, %v161_v41  ;;  %v747_v46 = vpop.f32.mrb[3].mxu1 }
  0xfa   :  { %v268_v47 = vadd.f32 %v635_v37, %v257_v45  ;;  %v269_v48 = vmax.f32 %v267_v44, 0.0 }
  0xfc   :  { %v270_v49 = vmax.f32 %v268_v47, 0.0 }
  0xfe   :  { %v271_v50 = vpack.c.bf16 %v270_v49, %v269_v48 }
 0x100   :  { %765 = vmatmul.mubr.bf16.vlgmr.msra.gmra.mrb[4].mxu0 %v271_v50 }
 0x101   :  { %804 = vmatprep.mubr.msk.bf16.mxu0 %vm852_vm0, %v851_v0  ;;  %789 = vmatpush3.bf16.msra.mxu0 %v843_v53 }
 0x102   :  { %790 = vmatprep.subr.bf16.mxu0 %v851_v0 }
 0x105   :  { %791 = vmatpush3.bf16.msra.mxu0 %v844_v54 }
 0x106   :  { %792 = vmatprep.subr.bf16.mxu0 %v851_v0 }
 0x109   :  { %793 = vmatpush3.bf16.msra.mxu0 %v845_v55 }
 0x10a   :  { %794 = vmatprep.subr.bf16.mxu0 %v851_v0 }
 0x10d   :  { %795 = vmatpush3.bf16.msra.mxu0 %v846_v56 }
 0x10e   :  { %796 = vmatprep.subr.bf16.mxu0 %v851_v0 }
 0x111   :  { %797 = vmatpush3.bf16.msra.mxu0 %v847_v57 }
 0x112   :  { %798 = vmatprep.subr.bf16.mxu0 %v851_v0 }
 0x115   :  { %799 = vmatpush3.bf16.msra.mxu0 %v848_v58 }
 0x116   :  { %800 = vmatprep.subr.bf16.mxu0 %v851_v0 }
 0x119   :  { %801 = vmatpush3.bf16.msra.mxu0 %v849_v4 }
 0x11a   :  { %802 = vmatprep.subr.bf16.mxu0 %v851_v0  ;;  %v654_v0 = vld [vmem:[%s1120_s10] ss:$0 sm:$0xff] }
 0x11d   :  { %803 = vmatpush3.bf16.msra.mxu0 %v850_v5 }
 0x1d3   :  { %v377_v60 = vpop.f32.mrb[4].mxu0 }
 0x1d4   :  { %v766_v61 = vpop.f32.mrb[5].mxu0  ;;  %v378_v63 = vadd.f32 %v636_v59, %v377_v60 }
 0x1d5   :  { %v380_v62 = vpop.f32.mrb[6].mxu0 }
 0x1d6   :  { %v381_v1 = vadd.f32 %v636_v59, %v380_v62  ;;  %v767_v2 = vpop.f32.mrb[7].mxu0 }
 0x1d8   :  { %v384_v3 = vpack.c.bf16 %v381_v1, %v378_v63 }
 0x1da   :  { %785 = vmatmul.mubr.bf16.vlgmr.msra.gmra.mrb[4].mxu1 %v384_v3 }
 0x2ad   :  { %v490_v7 = vpop.f32.mrb[4].mxu1 }
 0x2ae   :  { %v491_v8 = vadd.f32 %v645_v6, %v490_v7  ;;  %v786_v9 = vpop.f32.mrb[5].mxu1 }
 0x2af   :  { %v493_v10 = vpop.f32.mrb[6].mxu1 }
 0x2b0   :  { %v494_v11 = vadd.f32 %v645_v6, %v493_v10  ;;  %v787_v12 = vpop.f32.mrb[7].mxu1  ;;  %v497_v13 = vmax.f32 %v491_v8, 0.0 }
 0x2b2   :  { %v498_v14 = vmax.f32 %v494_v11, 0.0 }
 0x2b4   :  { %v499_v15 = vpack.c.bf16 %v498_v14, %v497_v13 }
 0x2b6   :  { %805 = vmatmul.mubr.bf16.vlgmr.msra.gmra.mrb[8].mxu0 %v499_v15 }
 0x389   :  { %v605_v16 = vpop.f32.mrb[8].mxu0 }
 0x38a   :  { %v606_v17 = vadd.f32 %v654_v0, %v605_v16  ;;  %v806_v18 = vpop.f32.mrb[9].mxu0 }
 0x38b   :  { %v608_v19 = vpop.f32.mrb[10].mxu0 }
 0x38c   :  { %612 = vst [vmem:[%s1121_s11] sm:$0xff] %v606_v17  ;;  %v609_v20 = vadd.f32 %v654_v0, %v608_v19  ;;  %v807_v21 = vpop.f32.mrb[11].mxu0 }
 0x38e   :  { %613 = vst [vmem:[%s1121_s11 + $0x8] sm:$0xff] %v609_v20 }

// kernel: gnn_denoiser_forward.9
= control target key start
LH: loop header
LB: loop body
LE: loop exit
PB: predicated region body
PF: predicated region fallthrough
CT: control target
= control target key end

     0   :  { %v538_v0 = vmov 0.0   ;;  %vm539_vm0 = vmmov 0   ;;  %s700_s3 = inlined_call_operand.vmem [shape: bf16[128,128], index: 3, kind: input, shape index: {}]   ;;  %s701_s2 = inlined_call_operand.vmem [shape: bf16[128,128], index: 2, kind: input, shape index: {}]   ;;  %s702_s0 = inlined_call_operand.vmem [shape: bf16[16,128], index: 0, kind: input, shape index: {}]   ;;  %s703_s5 = inlined_call_operand.vmem [shape: bf16[128,128], index: 5, kind: input, shape index: {}]   ;;  %s704_s1 = inlined_call_operand.vmem [shape: f32[16,128], index: 1, kind: input, shape index: {}]   ;;  %s705_s4 = inlined_call_operand.vmem [shape: f32[1,128], index: 4, kind: input, shape index: {}]   ;;  %s706_s6 = inlined_call_operand.vmem [shape: f32[1,128], index: 6, kind: input, shape index: {}]   ;;  %s707_s7 = inlined_call_operand.vmem [shape: bf16[16,128], index: 7, kind: output, shape index: {}]  }
   0x1   :  { %451 = vmatprep.subr.bf16.mxu0 %v538_v0  ;;  %471 = vmatprep.subr.bf16.mxu1 %v538_v0  ;;  %v513_v1 = vld [vmem:[%s700_s3] sm:$0xff]   ;;  %v515_v3 = vld [vmem:[%s700_s3 + $0x8] sm:$0xff]   ;;  %v517_v5 = vld [vmem:[%s700_s3 + $0x10] sm:$0xff]  }
   0x2   :  { %v514_v2 = vld [vmem:[%s701_s2] sm:$0xff]   ;;  %467 = vmatprep.mubr.msk.bf16.mxu0 %vm539_vm0, %v538_v0  ;;  %487 = vmatprep.mubr.msk.bf16.mxu1 %vm539_vm0, %v538_v0  ;;  %v516_v4 = vld [vmem:[%s701_s2 + $0x8] sm:$0xff]   ;;  %v518_v6 = vld [vmem:[%s701_s2 + $0x10] sm:$0xff]  }
   0x3   :  { %452 = vmatpush3.bf16.msra.mxu0 %v513_v1  ;;  %472 = vmatpush3.bf16.msra.mxu1 %v514_v2  ;;  %v519_v7 = vld [vmem:[%s700_s3 + $0x18] sm:$0xff]   ;;  %v521_v9 = vld [vmem:[%s700_s3 + $0x20] sm:$0xff]   ;;  %v523_v11 = vld [vmem:[%s700_s3 + $0x28] sm:$0xff]  }
   0x4   :  { %453 = vmatprep.subr.bf16.mxu0 %v538_v0  ;;  %473 = vmatprep.subr.bf16.mxu1 %v538_v0  ;;  %v520_v8 = vld [vmem:[%s701_s2 + $0x18] sm:$0xff]   ;;  %v522_v10 = vld [vmem:[%s701_s2 + $0x20] sm:$0xff]   ;;  %v524_v12 = vld [vmem:[%s701_s2 + $0x28] sm:$0xff]  }
   0x5   :  { %v525_v13 = vld [vmem:[%s700_s3 + $0x30] sm:$0xff]   ;;  %v527_v15 = vld [vmem:[%s700_s3 + $0x38] sm:$0xff]   ;;  %v45_v16 = vld [vmem:[%s704_s1] sm:$0xff] }
   0x6   :  { %v526_v14 = vld [vmem:[%s701_s2 + $0x30] sm:$0xff]   ;;  %v46_v17 = vld [vmem:[%s704_s1 + $0x8] sm:$0xff]  ;;  %v528_v18 = vld [vmem:[%s701_s2 + $0x38] sm:$0xff]  }
   0x7   :  { %454 = vmatpush3.bf16.msra.mxu0 %v515_v3  ;;  %474 = vmatpush3.bf16.msra.mxu1 %v516_v4  ;;  %v47_v19 = vpack.c.bf16 %v46_v17, %v45_v16  ;;  %v529_v20 = vld [vmem:[%s702_s0] sm:$0xff]   ;;  %v531_v22 = vld [vmem:[%s703_s5 + $0x8] sm:$0xff]   ;;  %v532_v23 = vld [vmem:[%s703_s5 + $0x10] sm:$0xff]  }
   0x8   :  { %455 = vmatprep.subr.bf16.mxu0 %v538_v0  ;;  %475 = vmatprep.subr.bf16.mxu1 %v538_v0  ;;  %v530_v21 = vld [vmem:[%s703_s5] sm:$0xff]   ;;  %v533_v24 = vld [vmem:[%s703_s5 + $0x18] sm:$0xff]   ;;  %v535_v26 = vld [vmem:[%s703_s5 + $0x28] sm:$0xff]  }
   0x9   :  { %v534_v25 = vld [vmem:[%s703_s5 + $0x20] sm:$0xff]   ;;  %v536_v27 = vld [vmem:[%s703_s5 + $0x30] sm:$0xff]   ;;  %v537_v28 = vld [vmem:[%s703_s5 + $0x38] sm:$0xff]  }
   0xa   :  { %v405_v31 = vld [vmem:[%s705_s4] ss:$0 sm:$0xff] }
   0xb   :  { %456 = vmatpush3.bf16.msra.mxu0 %v517_v5  ;;  %476 = vmatpush3.bf16.msra.mxu1 %v518_v6  ;;  %v406_v45 = vld [vmem:[%s706_s6] ss:$0 sm:$0xff] }
   0xc   :  { %457 = vmatprep.subr.bf16.mxu0 %v538_v0  ;;  %477 = vmatprep.subr.bf16.mxu1 %v538_v0 }
   0xf   :  { %458 = vmatpush3.bf16.msra.mxu0 %v519_v7  ;;  %478 = vmatpush3.bf16.msra.mxu1 %v520_v8 }
  0x10   :  { %459 = vmatprep.subr.bf16.mxu0 %v538_v0  ;;  %479 = vmatprep.subr.bf16.mxu1 %v538_v0 }
  0x13   :  { %460 = vmatpush3.bf16.msra.mxu0 %v521_v9  ;;  %480 = vmatpush3.bf16.msra.mxu1 %v522_v10 }
  0x14   :  { %461 = vmatprep.subr.bf16.mxu0 %v538_v0  ;;  %481 = vmatprep.subr.bf16.mxu1 %v538_v0 }
  0x17   :  { %462 = vmatpush3.bf16.msra.mxu0 %v523_v11  ;;  %482 = vmatpush3.bf16.msra.mxu1 %v524_v12 }
  0x18   :  { %463 = vmatprep.subr.bf16.mxu0 %v538_v0  ;;  %483 = vmatprep.subr.bf16.mxu1 %v538_v0 }
  0x1b   :  { %464 = vmatpush3.bf16.msra.mxu0 %v525_v13  ;;  %484 = vmatpush3.bf16.msra.mxu1 %v526_v14 }
  0x1c   :  { %465 = vmatprep.subr.bf16.mxu0 %v538_v0  ;;  %485 = vmatprep.subr.bf16.mxu1 %v538_v0 }
  0x1f   :  { %466 = vmatpush3.bf16.msra.mxu0 %v527_v15  ;;  %486 = vmatpush3.bf16.msra.mxu1 %v528_v18 }
  0x20   :  { %491 = vmatprep.subr.bf16.mxu0 %v538_v0 }
  0x22   :  { %468 = vmatmul.mubr.bf16.vlgmr.msra.gmra.mrb[0].mxu0 %v47_v19  ;;  %488 = vmatmul.mubr.bf16.vlgmr.msra.gmra.mrb[0].mxu1 %v529_v20 }
  0x23   :  { %492 = vmatpush3.bf16.msra.mxu0 %v530_v21  ;;  %507 = vmatprep.mubr.msk.bf16.mxu0 %vm539_vm0, %v538_v0 }
  0x24   :  { %493 = vmatprep.subr.bf16.mxu0 %v538_v0 }
  0x27   :  { %494 = vmatpush3.bf16.msra.mxu0 %v531_v22 }
  0x28   :  { %495 = vmatprep.subr.bf16.mxu0 %v538_v0 }
  0x2b   :  { %496 = vmatpush3.bf16.msra.mxu0 %v532_v23 }
  0x2c   :  { %497 = vmatprep.subr.bf16.mxu0 %v538_v0 }
  0x2f   :  { %498 = vmatpush3.bf16.msra.mxu0 %v533_v24 }
  0x30   :  { %499 = vmatprep.subr.bf16.mxu0 %v538_v0 }
  0x33   :  { %500 = vmatpush3.bf16.msra.mxu0 %v534_v25 }
  0x34   :  { %501 = vmatprep.subr.bf16.mxu0 %v538_v0 }
  0x37   :  { %502 = vmatpush3.bf16.msra.mxu0 %v535_v26 }
  0x38   :  { %503 = vmatprep.subr.bf16.mxu0 %v538_v0 }
  0x3b   :  { %504 = vmatpush3.bf16.msra.mxu0 %v536_v27 }
  0x3c   :  { %505 = vmatprep.subr.bf16.mxu0 %v538_v0 }
  0x3f   :  { %506 = vmatpush3.bf16.msra.mxu0 %v537_v28 }
  0xf5   :  { %v146_v29 = vpop.f32.mrb[0].mxu0  ;;  %v241_v30 = vpop.f32.mrb[0].mxu1 }
  0xf6   :  { %v469_v32 = vpop.f32.mrb[1].mxu0  ;;  %v242_v33 = vadd.f32 %v241_v30, %v146_v29  ;;  %v489_v34 = vpop.f32.mrb[1].mxu1 }
  0xf7   :  { %v149_v35 = vpop.f32.mrb[2].mxu0  ;;  %v244_v36 = vpop.f32.mrb[2].mxu1 }
  0xf8   :  { %v470_v37 = vpop.f32.mrb[3].mxu0  ;;  %v255_v38 = vadd.f32 %v405_v31, %v242_v33  ;;  %v245_v39 = vadd.f32 %v244_v36, %v149_v35  ;;  %v490_v40 = vpop.f32.mrb[3].mxu1 }
  0xfa   :  { %v256_v41 = vadd.f32 %v405_v31, %v245_v39  ;;  %v257_v42 = vmax.f32 %v255_v38, 0.0 }
  0xfc   :  { %v258_v43 = vmax.f32 %v256_v41, 0.0 }
  0xfe   :  { %v259_v44 = vpack.c.bf16 %v258_v43, %v257_v42 }
 0x100   :  { %508 = vmatmul.mubr.bf16.vlgmr.msra.gmra.mrb[4].mxu0 %v259_v44 }
 0x1d3   :  { %v365_v46 = vpop.f32.mrb[4].mxu0 }
 0x1d4   :  { %v366_v47 = vadd.f32 %v406_v45, %v365_v46  ;;  %v509_v48 = vpop.f32.mrb[5].mxu0 }
 0x1d5   :  { %v368_v49 = vpop.f32.mrb[6].mxu0 }
 0x1d6   :  { %v369_v50 = vadd.f32 %v406_v45, %v368_v49  ;;  %v510_v51 = vpop.f32.mrb[7].mxu0  ;;  %v372_v52 = vmax.f32 %v366_v47, 0.0 }
 0x1d8   :  { %v373_v53 = vmax.f32 %v369_v50, 0.0 }
 0x1da   :  { %v422_v54 = vpack.c.bf16 %v373_v53, %v372_v52 }
 0x1dc   :  { %423 = vst [vmem:[%s707_s7] sm:$0xff] %v422_v54  }

// kernel: gnn_denoiser_forward.8
= control target key start
LH: loop header
LB: loop body
LE: loop exit
PB: predicated region body
PF: predicated region fallthrough
CT: control target
= control target key end

     0   :  { %s820_s0 = inlined_call_operand.vmem [shape: s32[32], index: 0, kind: input, shape index: {}]   ;;  %s821_s1 = inlined_call_operand.vmem [shape: bf16[32,128], index: 1, kind: input, shape index: {}]   ;;  %s822_s2 = inlined_call_operand.vmem [shape: bf16[32,128], index: 2, kind: input, shape index: {}]   ;;  %s823_s3 = inlined_call_operand.vmem [shape: bf16[128,128], index: 3, kind: input, shape index: {}]   ;;  %s824_s4 = inlined_call_operand.vmem [shape: bf16[128,128], index: 4, kind: input, shape index: {}]   ;;  %s825_s5 = inlined_call_operand.vmem [shape: f32[1,128], index: 5, kind: input, shape index: {}]   ;;  %s826_s6 = inlined_call_operand.vmem [shape: bf16[128,128], index: 6, kind: input, shape index: {}]   ;;  %s827_s7 = inlined_call_operand.vmem [shape: f32[1,128], index: 7, kind: input, shape index: {}]   ;;  %s828_s8 = inlined_call_operand.vmem [shape: f32[16,128], index: 8, kind: output, shape index: {}]  }
   0x1   :  { %s13_s29 = sshll.u32 %s820_s0, 4  ;;  %s14_s29 = int_to_ptr.vmem [resolvable:$true] %s13_s29 }
   0x2   :  { %s649_s30 = scalar_lea.vmem %s14_s29, 16  ;;  %p654_p1 = scmp.lt.s32.totalorder %s14_s29, %s14_s29 }
   0x3   :  { %p650_p0 = scmp.ne.s32.totalorder %s14_s29, %s649_s30  ;;  %p655_p2 = scmp.lt.s32.totalorder %s649_s30, %s649_s30 }
   0x5   :  { %p656_p3 = por %p655_p2, %p654_p1 }
   0x7   :  { %p657_p4 = pnand %p656_p3, %p650_p0 }
   0x9   :  { %660 = shalt.err (!%p657_p4)  }
   0xa   :  { %s671_s9 = smov [#allocation4]  }
   0xb   :  { %16 = dma.vmem_to_smem %s14_s29, 16, %s671_s9, [#allocation3] }
   0xc   :  { %665 = dma.done.wait [#allocation3], 16 }
   0xd   :  { %666 = vsyncadd [#allocation3], 4294967280 }
   0xe   :  { %18 = sfence }
   0xf   :  { %v621_v0 = vld [vmem:[%s824_s4] sm:$0xff]   ;;  %v672_v1 = vmov 0.0   ;;  %v622_v2 = vld [vmem:[%s824_s4 + $0x8] sm:$0xff]   ;;  %v623_v3 = vld [vmem:[%s824_s4 + $0x10] sm:$0xff]  }
  0x10   :  { %38 = vst [vmem:[%s828_s8] sm:$0xff] %v672_v1  ;;  %39 = vst [vmem:[%s828_s8 + $0x8] sm:$0xff] %v672_v1  ;;  %547 = vmatprep.subr.bf16.mxu0 %v621_v0  ;;  %v624_v4 = vld [vmem:[%s824_s4 + $0x18] sm:$0xff]   ;;  %v629_v5 = vld [vmem:[%s822_s2] sm:$0xff]  }
  0x11   :  { %548 = vmatpush3.bf16.msra.mxu0 %v621_v0  ;;  %563 = vmatprep.mubr.bf16.mxu0 %v629_v5  ;;  %v625_v6 = vld [vmem:[%s824_s4 + $0x20] sm:$0xff]   ;;  %v626_v7 = vld [vmem:[%s824_s4 + $0x28] sm:$0xff]   ;;  %v627_v8 = vld [vmem:[%s824_s4 + $0x30] sm:$0xff]  }
  0x12   :  { %549 = vmatprep.subr.bf16.mxu0 %v622_v2  ;;  %v641_v9 = vld [vmem:[%s826_s6] sm:$0xff]   ;;  %v642_v10 = vld [vmem:[%s826_s6 + $0x8] sm:$0xff]   ;;  %v628_v11 = vld [vmem:[%s824_s4 + $0x38] sm:$0xff]  }
  0x13   :  { %587 = vmatprep.subr.bf16.mxu1 %v641_v9  ;;  %v643_v12 = vld [vmem:[%s826_s6 + $0x10] sm:$0xff]   ;;  %v630_v13 = vld [vmem:[%s823_s3] sm:$0xff]   ;;  %v644_v14 = vld [vmem:[%s826_s6 + $0x18] sm:$0xff]  }
  0x14   :  { %588 = vmatpush3.bf16.msra.mxu1 %v641_v9  ;;  %v631_v15 = vld [vmem:[%s822_s2 + $0x8] sm:$0xff]   ;;  %v639_v16 = vld [vmem:[%s821_s1] sm:$0xff]   ;;  %v633_v19 = vld [vmem:[%s823_s3 + $0x10] sm:$0xff]  }
  0x15   :  { %550 = vmatpush3.bf16.msra.mxu0 %v622_v2  ;;  %589 = vmatprep.subr.bf16.mxu1 %v642_v10  ;;  %v632_v17 = vld [vmem:[%s823_s3 + $0x8] sm:$0xff]   ;;  %v645_v18 = vld [vmem:[%s826_s6 + $0x20] sm:$0xff]   ;;  %v634_v21 = vld [vmem:[%s823_s3 + $0x18] sm:$0xff]  }
  0x16   :  { %551 = vmatprep.subr.bf16.mxu0 %v623_v3  ;;  %v646_v20 = vld [vmem:[%s826_s6 + $0x28] sm:$0xff]   ;;  %v635_v22 = vld [vmem:[%s823_s3 + $0x20] sm:$0xff]   ;;  %v637_v24 = vld [vmem:[%s823_s3 + $0x30] sm:$0xff]  }
  0x17   :  { %v636_v23 = vld [vmem:[%s823_s3 + $0x28] sm:$0xff]   ;;  %v638_v25 = vld [vmem:[%s823_s3 + $0x38] sm:$0xff]   ;;  %v647_v27 = vld [vmem:[%s826_s6 + $0x30] sm:$0xff]  }
  0x18   :  { %590 = vmatpush3.bf16.msra.mxu1 %v642_v10  ;;  %v640_v26 = vld [vmem:[%s821_s1 + $0x8] sm:$0xff]   ;;  %v648_v28 = vld [vmem:[%s826_s6 + $0x38] sm:$0xff]   ;;  %v507_v29 = vld [vmem:[%s825_s5] ss:$0 sm:$0xff]  ;;  %s667_s5 = smov 0  }
  0x19   :  { %552 = vmatpush3.bf16.msra.mxu0 %v623_v3  ;;  %591 = vmatprep.subr.bf16.mxu1 %v643_v12  ;;  %v508_v44 = vld [vmem:[%s827_s7] ss:$0 sm:$0xff] }
  0x1a   :  { %553 = vmatprep.subr.bf16.mxu0 %v624_v4 }
  0x1c   :  { %592 = vmatpush3.bf16.msra.mxu1 %v643_v12 }
  0x1d   :  { %554 = vmatpush3.bf16.msra.mxu0 %v624_v4  ;;  %593 = vmatprep.subr.bf16.mxu1 %v644_v14 }
  0x1e   :  { %555 = vmatprep.subr.bf16.mxu0 %v625_v6 }
  0x20   :  { %594 = vmatpush3.bf16.msra.mxu1 %v644_v14 }
  0x21   :  { %556 = vmatpush3.bf16.msra.mxu0 %v625_v6  ;;  %595 = vmatprep.subr.bf16.mxu1 %v645_v18 }
  0x22   :  { %557 = vmatprep.subr.bf16.mxu0 %v626_v7 }
  0x24   :  { %596 = vmatpush3.bf16.msra.mxu1 %v645_v18 }
  0x25   :  { %558 = vmatpush3.bf16.msra.mxu0 %v626_v7  ;;  %597 = vmatprep.subr.bf16.mxu1 %v646_v20 }
  0x26   :  { %559 = vmatprep.subr.bf16.mxu0 %v627_v8 }
  0x28   :  { %598 = vmatpush3.bf16.msra.mxu1 %v646_v20 }
  0x29   :  { %560 = vmatpush3.bf16.msra.mxu0 %v627_v8  ;;  %599 = vmatprep.subr.bf16.mxu1 %v647_v27 }
  0x2a   :  { %561 = vmatprep.subr.bf16.mxu0 %v628_v11 }
  0x2c   :  { %600 = vmatpush3.bf16.msra.mxu1 %v647_v27 }
  0x2d   :  { %562 = vmatpush3.bf16.msra.mxu0 %v628_v11  ;;  %601 = vmatprep.subr.bf16.mxu1 %v648_v28 }
  0x2e   :  { %567 = vmatprep.subr.bf16.mxu0 %v630_v13 }
  0x30   :  { %564 = vmatmul.mubr.bf16.vlgmr.msra.gmra.mrb[0].mxu0 %v631_v15  ;;  %602 = vmatpush3.bf16.msra.mxu1 %v648_v28 }
  0x31   :  { %568 = vmatpush3.bf16.msra.mxu0 %v630_v13  ;;  %583 = vmatprep.mubr.bf16.mxu0 %v639_v16 }
  0x32   :  { %569 = vmatprep.subr.bf16.mxu0 %v632_v17 }
  0x35   :  { %570 = vmatpush3.bf16.msra.mxu0 %v632_v17 }
  0x36   :  { %571 = vmatprep.subr.bf16.mxu0 %v633_v19 }
  0x39   :  { %572 = vmatpush3.bf16.msra.mxu0 %v633_v19 }
  0x3a   :  { %573 = vmatprep.subr.bf16.mxu0 %v634_v21 }
  0x3d   :  { %574 = vmatpush3.bf16.msra.mxu0 %v634_v21 }
  0x3e   :  { %575 = vmatprep.subr.bf16.mxu0 %v635_v22 }
  0x41   :  { %576 = vmatpush3.bf16.msra.mxu0 %v635_v22 }
  0x42   :  { %577 = vmatprep.subr.bf16.mxu0 %v636_v23 }
  0x45   :  { %578 = vmatpush3.bf16.msra.mxu0 %v636_v23 }
  0x46   :  { %579 = vmatprep.subr.bf16.mxu0 %v637_v24 }
  0x49   :  { %580 = vmatpush3.bf16.msra.mxu0 %v637_v24 }
  0x4a   :  { %581 = vmatprep.subr.bf16.mxu0 %v638_v25 }
  0x4d   :  { %582 = vmatpush3.bf16.msra.mxu0 %v638_v25 }
  0x50   :  { %584 = vmatmul.mubr.bf16.vlgmr.msra.gmra.mrb[0].mxu0 %v640_v26 }
 0x123   :  { %v585_v30 = vpop.f32.mrb[0].mxu0 }
 0x124   :  { %v307_v31 = vadd.f32 %v585_v30, %v507_v29  ;;  %v283_v32 = vpop.f32.mrb[1].mxu0 }
 0x125   :  { %v305_v33 = vadd.f32 %v507_v29, %v283_v32  ;;  %v586_v34 = vpop.f32.mrb[2].mxu0 }
 0x126   :  { %v308_v35 = vadd.f32 %v586_v34, %v507_v29  ;;  %v286_v36 = vpop.f32.mrb[3].mxu0  ;;  %v311_v38 = vmax.f32 %v307_v31, 0.0 }
 0x127   :  { %v306_v37 = vadd.f32 %v507_v29, %v286_v36  ;;  %v309_v40 = vmax.f32 %v305_v33, 0.0 }
 0x128   :  { %v312_v39 = vmax.f32 %v308_v35, 0.0 }
 0x129   :  { %v310_v41 = vmax.f32 %v306_v37, 0.0 }
 0x12a   :  { %v314_v42 = vpack.c.bf16 %v312_v39, %v311_v38 }
 0x12b   :  { %v313_v43 = vpack.c.bf16 %v310_v41, %v309_v40 }
 0x12d   :  { %603 = vmatprep.mubr.bf16.mxu1 %v313_v43 }
 0x12e   :  { %604 = vmatmul.mubr.bf16.vlgmr.msra.gmra.mrb[0].mxu1 %v314_v42 }
 0x201   :  { %v605_v45 = vpop.f32.mrb[0].mxu1 }
 0x202   :  { %v429_v46 = vadd.f32 %v605_v45, %v508_v44  ;;  %v420_v47 = vpop.f32.mrb[1].mxu1 }
 0x203   :  { %v421_v48 = vadd.f32 %v508_v44, %v420_v47  ;;  %v606_v49 = vpop.f32.mrb[2].mxu1 }
 0x204   :  { %v437_v50 = vmax.f32 %v429_v46, 0.0  ;;  %v432_v51 = vadd.f32 %v606_v49, %v508_v44  ;;  %v423_v52 = vpop.f32.mrb[3].mxu1 }
 0x205   :  { %v435_v53 = vmax.f32 %v421_v48, 0.0  ;;  %v424_v54 = vadd.f32 %v508_v44, %v423_v52 }
 0x206   :  { %460 = vst [vmem:[#allocation2 + $0x10] sm:$0xff] %v437_v50  ;;  %v438_v55 = vmax.f32 %v432_v51, 0.0 }
 0x207   :  { %458 = vst [vmem:[#allocation2] sm:$0xff] %v435_v53  ;;  %v436_v56 = vmax.f32 %v424_v54, 0.0 }
 0x208   :  { %461 = vst [vmem:[#allocation2 + $0x18] sm:$0xff] %v438_v55 }
 0x209   :  { %459 = vst [vmem:[#allocation2 + $0x8] sm:$0xff] %v436_v56 }
 0x20a LB: > { %s469_s7 = sld [smem:[#allocation4 + %s669_s5]]  ;;  %s472_s21 = scalar_lea.vmem [#allocation2], %s669_s5  ;;  %s669_s5 = sphi %s667_s5, %s467_s5  }
 0x20b   : > { %s467_s5 = sadd.s32 1, %s669_s5  }
 0x20c   : > { %p464_p5 = scmp.ge.s32.totalorder %s467_s5, 32  }
 0x20e   :  { %466 = sbr.rel (!%p464_p5) target bundleno = 522 (0x20a), region = 61 }
 0x210   : > { %v473_v57 = vld [vmem:[%s472_s21] sm:$0x1]  ;;  %s470_s24 = scalar_lea.vmem %s828_s8, %s469_s7 }
 0x211   : > { %v471_v58 = vld [vmem:[%s470_s24] sm:$0x1] }
 0x212   : > { %v474_v59 = vadd.f32 %v473_v57, %v471_v58 }
 0x214   : > { %475 = vst [vmem:[%s470_s24] sm:$0x1] %v474_v59 }

</bundles_post_ra>
